<compile_context>
chip_gen: v7x
topology: tpu7x:2x2x1
jax: 0.10.0
libtpu: 0.0.40
codegen_flags: <defaults>
</compile_context>

<pallas_src>
import jax
import jax.numpy as jnp
from jax.experimental import pallas as pl
from jax.experimental.pallas import tpu as pltpu

# Model dims (PyTorch spec) and lane-padded counterparts.
INPUT_SIZE, HIDDEN1, HIDDEN2, OUTPUT_SIZE = 210, 128, 256, 300
PAD_IN, PAD_OUT = 256, 384          # 210 -> 256, 300 -> 384 (multiples of 128)
TILE_B = 128                        # row tile per grid step (fills MXU height)


def _sigmoid(h):
    # tanh-based sigmoid: single EUP transcendental instead of exp + divide.
    return 0.5 * (jnp.tanh(0.5 * h) + 1.0)


def _mlp_kernel(x_ref, w1_ref, b1_ref, w2_ref, b2_ref, w3_ref, b3_ref, o_ref):
    # x_ref: (TILE_B, PAD_IN) bf16; weights bf16; biases fp32; output fp32.
    x = x_ref[...]
    h1 = jnp.dot(x, w1_ref[...], preferred_element_type=jnp.float32) + b1_ref[...]
    h1 = _sigmoid(h1)
    h2 = jnp.dot(h1.astype(jnp.bfloat16), w2_ref[...],
                 preferred_element_type=jnp.float32) + b2_ref[...]
    h2 = _sigmoid(h2)
    h3 = jnp.dot(h2.astype(jnp.bfloat16), w3_ref[...],
                 preferred_element_type=jnp.float32) + b3_ref[...]
    o_ref[...] = _sigmoid(h3).astype(o_ref.dtype)


def prepare_params(params):
    """Pad odd dims to multiples of 128 and cast weights to bf16 (done once)."""
    w1, b1, w2, b2, w3, b3 = params
    w1p = jnp.zeros((PAD_IN, HIDDEN1), jnp.float32).at[:INPUT_SIZE, :].set(w1)
    w3p = jnp.zeros((HIDDEN2, PAD_OUT), jnp.float32).at[:, :OUTPUT_SIZE].set(w3)
    b3p = jnp.zeros((1, PAD_OUT), jnp.float32).at[:, :OUTPUT_SIZE].set(b3)
    return (w1p.astype(jnp.bfloat16), b1.astype(jnp.float32),
            w2.astype(jnp.bfloat16), b2.astype(jnp.float32),
            w3p.astype(jnp.bfloat16), b3p)


@jax.jit
def neural_net_forward(x, prepared_params):
    """Forward pass. x: (B, 210) fp32. Returns (B, 300) fp32 probabilities."""
    w1, b1, w2, b2, w3, b3 = prepared_params
    B = x.shape[0]
    Bp = ((B + TILE_B - 1) // TILE_B) * TILE_B

    # Pad batch and feature dims with zeros (zero rows of w1 kill padded x cols).
    xp = jnp.zeros((Bp, PAD_IN), jnp.bfloat16)
    xp = xp.at[:B, :INPUT_SIZE].set(x.astype(jnp.bfloat16))

    num_tiles = Bp // TILE_B

    # Weights/biases: same block for every grid step -> stay VMEM-resident.
    resident = lambda a: pl.BlockSpec(a.shape, lambda i: (0, 0))

    flops = 2 * Bp * (PAD_IN * HIDDEN1 + HIDDEN1 * HIDDEN2 + HIDDEN2 * PAD_OUT)
    transcendentals = Bp * (HIDDEN1 + HIDDEN2 + PAD_OUT)
    bytes_accessed = (xp.size * 2
                      + (w1.size + w2.size + w3.size) * 2
                      + (b1.size + b2.size + b3.size) * 4
                      + Bp * PAD_OUT * 4)

    out_pad = pl.pallas_call(
        _mlp_kernel,
        out_shape=jax.ShapeDtypeStruct((Bp, PAD_OUT), jnp.float32),
        grid=(num_tiles,),
        in_specs=[
            pl.BlockSpec((TILE_B, PAD_IN), lambda i: (i, 0)),   # x: row-tiled
            resident(w1), resident(b1),
            resident(w2), resident(b2),
            resident(w3), resident(b3),
        ],
        out_specs=pl.BlockSpec((TILE_B, PAD_OUT), lambda i: (i, 0)),
        compiler_params=pltpu.CompilerParams(
            dimension_semantics=("parallel",)),
        cost_estimate=pl.CostEstimate(flops=flops,
                                      transcendentals=transcendentals,
                                      bytes_accessed=bytes_accessed),
    )(xp, w1, b1, w2, b2, w3, b3)

    return out_pad[:B, :OUTPUT_SIZE]


def init_params(key, input_size=INPUT_SIZE, hidden1=HIDDEN1,
                hidden2=HIDDEN2, output_size=OUTPUT_SIZE):
    """Deterministic synthetic init mirroring nn.Linear shapes, stored as (in, out)."""
    ks = jax.random.split(key, 6)

    def linear(kw, kb, fan_in, fan_out):
        bound = 1.0 / jnp.sqrt(fan_in)
        w = jax.random.uniform(kw, (fan_in, fan_out), jnp.float32, -bound, bound)
        b = jax.random.uniform(kb, (1, fan_out), jnp.float32, -bound, bound)
        return w, b

    w1, b1 = linear(ks[0], ks[1], input_size, hidden1)
    w2, b2 = linear(ks[2], ks[3], hidden1, hidden2)
    w3, b3 = linear(ks[4], ks[5], hidden2, output_size)
    return (w1, b1, w2, b2, w3, b3)


if __name__ == "__main__":
    key = jax.random.PRNGKey(0)
    k_x, k_p = jax.random.split(key)

    B = 8  # 5 ships * 6 attrs + 30 missiles * 6 attrs = 210 inputs
    x = jax.random.normal(k_x, (B, INPUT_SIZE), dtype=jnp.float32)
    params = init_params(k_p)
    prepped = prepare_params(params)

    out = neural_net_forward(x, prepped)
    out = jax.block_until_ready(out)

    # Reference in plain fp32 JAX (original sigmoid). bf16 weights through three
    # sigmoid layers -> loosened tolerance.
    w1, b1, w2, b2, w3, b3 = params
    ref = jax.nn.sigmoid(
        jax.nn.sigmoid(jax.nn.sigmoid(x @ w1 + b1) @ w2 + b2) @ w3 + b3
    )
    assert out.shape == (B, OUTPUT_SIZE)
    assert jnp.max(jnp.abs(out - ref)) < 3e-2, float(jnp.max(jnp.abs(out - ref)))

    print("KERNEL_OK")
</pallas_src>

<mosaic_0001>
module attributes {stable_mosaic.version = 11 : i64} {
  func.func @_mlp_kernel(%arg0: i32, %arg1: memref<128x256xbf16, #tpu.memory_space<vmem>>, %arg2: memref<256x128xbf16, #tpu.memory_space<vmem>>, %arg3: memref<1x128xf32, #tpu.memory_space<vmem>>, %arg4: memref<128x256xbf16, #tpu.memory_space<vmem>>, %arg5: memref<1x256xf32, #tpu.memory_space<vmem>>, %arg6: memref<256x384xbf16, #tpu.memory_space<vmem>>, %arg7: memref<1x384xf32, #tpu.memory_space<vmem>>, %arg8: memref<128x384xf32, #tpu.memory_space<vmem>>) attributes {dimension_semantics = [#tpu.dimension_semantics<parallel>], iteration_bounds = array<i64: 1>, scalar_prefetch = 0 : i64, scratch_operands = 0 : i64, tpu.core_type = #tpu.core_type<tc>, window_params = [{transform_indices = @transform_0, window_bounds = array<i64: 128, 256>}, {pipeline_mode = #tpu.pipeline_mode<synchronous>, transform_indices = @transform_1, window_bounds = array<i64: 256, 128>}, {pipeline_mode = #tpu.pipeline_mode<synchronous>, transform_indices = @transform_2, window_bounds = array<i64: 1, 128>}, {pipeline_mode = #tpu.pipeline_mode<synchronous>, transform_indices = @transform_3, window_bounds = array<i64: 128, 256>}, {pipeline_mode = #tpu.pipeline_mode<synchronous>, transform_indices = @transform_4, window_bounds = array<i64: 1, 256>}, {pipeline_mode = #tpu.pipeline_mode<synchronous>, transform_indices = @transform_5, window_bounds = array<i64: 256, 384>}, {pipeline_mode = #tpu.pipeline_mode<synchronous>, transform_indices = @transform_6, window_bounds = array<i64: 1, 384>}, {transform_indices = @transform_7, window_bounds = array<i64: 128, 384>}]} {
    %c0 = arith.constant 0 : index
    %c0_0 = arith.constant 0 : index
    %0 = vector.load %arg1[%c0, %c0_0] : memref<128x256xbf16, #tpu.memory_space<vmem>>, vector<128x256xbf16>
    %c0_1 = arith.constant 0 : index
    %c0_2 = arith.constant 0 : index
    %1 = vector.load %arg2[%c0_1, %c0_2] : memref<256x128xbf16, #tpu.memory_space<vmem>>, vector<256x128xbf16>
    %cst = arith.constant dense<0.000000e+00> : vector<128x128xf32>
    %2 = tpu.matmul %0, %1, %cst {dimension_numbers = #tpu.dot_dimension_numbers<[1], [0], [0], [1], [0, 0, 1, 1], [], []>} : vector<128x256xbf16>, vector<256x128xbf16>, vector<128x128xf32> -> vector<128x128xf32>
    %c0_3 = arith.constant 0 : index
    %c0_4 = arith.constant 0 : index
    %3 = vector.load %arg3[%c0_3, %c0_4] : memref<1x128xf32, #tpu.memory_space<vmem>>, vector<1x128xf32>
    %4 = vector.broadcast %3 : vector<1x128xf32> to vector<128x128xf32>
    %5 = arith.addf %2, %4 : vector<128x128xf32>
    %cst_5 = arith.constant 5.000000e-01 : f32
    %6 = vector.broadcast %cst_5 : f32 to vector<128x128xf32>
    %7 = arith.mulf %6, %5 : vector<128x128xf32>
    %8 = math.tanh %7 : vector<128x128xf32>
    %cst_6 = arith.constant 1.000000e+00 : f32
    %9 = vector.broadcast %cst_6 : f32 to vector<128x128xf32>
    %10 = arith.addf %8, %9 : vector<128x128xf32>
    %cst_7 = arith.constant 5.000000e-01 : f32
    %11 = vector.broadcast %cst_7 : f32 to vector<128x128xf32>
    %12 = arith.mulf %11, %10 : vector<128x128xf32>
    %13 = arith.truncf %12 : vector<128x128xf32> to vector<128x128xbf16>
    %c0_8 = arith.constant 0 : index
    %c0_9 = arith.constant 0 : index
    %14 = vector.load %arg4[%c0_8, %c0_9] : memref<128x256xbf16, #tpu.memory_space<vmem>>, vector<128x256xbf16>
    %cst_10 = arith.constant dense<0.000000e+00> : vector<128x256xf32>
    %15 = tpu.matmul %13, %14, %cst_10 {dimension_numbers = #tpu.dot_dimension_numbers<[1], [0], [0], [1], [0, 0, 1, 1], [], []>} : vector<128x128xbf16>, vector<128x256xbf16>, vector<128x256xf32> -> vector<128x256xf32>
    %c0_11 = arith.constant 0 : index
    %c0_12 = arith.constant 0 : index
    %16 = vector.load %arg5[%c0_11, %c0_12] : memref<1x256xf32, #tpu.memory_space<vmem>>, vector<1x256xf32>
    %17 = vector.broadcast %16 : vector<1x256xf32> to vector<128x256xf32>
    %18 = arith.addf %15, %17 : vector<128x256xf32>
    %cst_13 = arith.constant 5.000000e-01 : f32
    %19 = vector.broadcast %cst_13 : f32 to vector<128x256xf32>
    %20 = arith.mulf %19, %18 : vector<128x256xf32>
    %21 = math.tanh %20 : vector<128x256xf32>
    %cst_14 = arith.constant 1.000000e+00 : f32
    %22 = vector.broadcast %cst_14 : f32 to vector<128x256xf32>
    %23 = arith.addf %21, %22 : vector<128x256xf32>
    %cst_15 = arith.constant 5.000000e-01 : f32
    %24 = vector.broadcast %cst_15 : f32 to vector<128x256xf32>
    %25 = arith.mulf %24, %23 : vector<128x256xf32>
    %26 = arith.truncf %25 : vector<128x256xf32> to vector<128x256xbf16>
    %c0_16 = arith.constant 0 : index
    %c0_17 = arith.constant 0 : index
    %27 = vector.load %arg6[%c0_16, %c0_17] : memref<256x384xbf16, #tpu.memory_space<vmem>>, vector<256x384xbf16>
    %cst_18 = arith.constant dense<0.000000e+00> : vector<128x384xf32>
    %28 = tpu.matmul %26, %27, %cst_18 {dimension_numbers = #tpu.dot_dimension_numbers<[1], [0], [0], [1], [0, 0, 1, 1], [], []>} : vector<128x256xbf16>, vector<256x384xbf16>, vector<128x384xf32> -> vector<128x384xf32>
    %c0_19 = arith.constant 0 : index
    %c0_20 = arith.constant 0 : index
    %29 = vector.load %arg7[%c0_19, %c0_20] : memref<1x384xf32, #tpu.memory_space<vmem>>, vector<1x384xf32>
    %30 = vector.broadcast %29 : vector<1x384xf32> to vector<128x384xf32>
    %31 = arith.addf %28, %30 : vector<128x384xf32>
    %cst_21 = arith.constant 5.000000e-01 : f32
    %32 = vector.broadcast %cst_21 : f32 to vector<128x384xf32>
    %33 = arith.mulf %32, %31 : vector<128x384xf32>
    %34 = math.tanh %33 : vector<128x384xf32>
    %cst_22 = arith.constant 1.000000e+00 : f32
    %35 = vector.broadcast %cst_22 : f32 to vector<128x384xf32>
    %36 = arith.addf %34, %35 : vector<128x384xf32>
    %cst_23 = arith.constant 5.000000e-01 : f32
    %37 = vector.broadcast %cst_23 : f32 to vector<128x384xf32>
    %38 = arith.mulf %37, %36 : vector<128x384xf32>
    %c0_24 = arith.constant 0 : index
    %c0_25 = arith.constant 0 : index
    %39 = vector.load %arg8[%c0_24, %c0_25] : memref<128x384xf32, #tpu.memory_space<vmem>>, vector<128x384xf32>
    tpu.vector_store %arg8[%c0_24, %c0_25], %38 {strides = array<i32>} : memref<128x384xf32, #tpu.memory_space<vmem>>, vector<128x384xf32>,
    return
  }
  func.func @transform_0(%arg0: i32) -> (i32, i32) {
    %c0_i32 = arith.constant 0 : i32
    %c0_i32_0 = arith.constant 0 : i32
    return %arg0, %c0_i32 : i32, i32
  }
  func.func @transform_1(%arg0: i32) -> (i32, i32) {
    %c0_i32 = arith.constant 0 : i32
    %c0_i32_0 = arith.constant 0 : i32
    %c0_i32_1 = arith.constant 0 : i32
    return %c0_i32, %c0_i32_0 : i32, i32
  }
  func.func @transform_2(%arg0: i32) -> (i32, i32) {
    %c0_i32 = arith.constant 0 : i32
    %c0_i32_0 = arith.constant 0 : i32
    %c0_i32_1 = arith.constant 0 : i32
    return %c0_i32, %c0_i32_0 : i32, i32
  }
  func.func @transform_3(%arg0: i32) -> (i32, i32) {
    %c0_i32 = arith.constant 0 : i32
    %c0_i32_0 = arith.constant 0 : i32
    %c0_i32_1 = arith.constant 0 : i32
    return %c0_i32, %c0_i32_0 : i32, i32
  }
  func.func @transform_4(%arg0: i32) -> (i32, i32) {
    %c0_i32 = arith.constant 0 : i32
    %c0_i32_0 = arith.constant 0 : i32
    %c0_i32_1 = arith.constant 0 : i32
    return %c0_i32, %c0_i32_0 : i32, i32
  }
  func.func @transform_5(%arg0: i32) -> (i32, i32) {
    %c0_i32 = arith.constant 0 : i32
    %c0_i32_0 = arith.constant 0 : i32
    %c0_i32_1 = arith.constant 0 : i32
    return %c0_i32, %c0_i32_0 : i32, i32
  }
  func.func @transform_6(%arg0: i32) -> (i32, i32) {
    %c0_i32 = arith.constant 0 : i32
    %c0_i32_0 = arith.constant 0 : i32
    %c0_i32_1 = arith.constant 0 : i32
    return %c0_i32, %c0_i32_0 : i32, i32
  }
  func.func @transform_7(%arg0: i32) -> (i32, i32) {
    %c0_i32 = arith.constant 0 : i32
    %c0_i32_0 = arith.constant 0 : i32
    return %arg0, %c0_i32 : i32, i32
  }
}

</mosaic_0001>

<bundles_post_ra>
// kernel: neural_net_forward.1
= control target key start
LH: loop header
LB: loop body
LE: loop exit
PB: predicated region body
PF: predicated region fallthrough
CT: control target
= control target key end

     0   :  { %12 = vsyncpa [#allocation3], 0  ;;  %s2662_s0 = inlined_call_operand.vmem [shape: bf16[128,256], index: 0, kind: input, shape index: {}]   ;;  %s2663_s1 = inlined_call_operand.vmem [shape: bf16[256,128], index: 1, kind: input, shape index: {}]   ;;  %s2664_s2 = inlined_call_operand.vmem [shape: f32[1,128], index: 2, kind: input, shape index: {}]   ;;  %s2665_s3 = inlined_call_operand.hbm [shape: bf16[128,256], index: 3, kind: input, shape index: {}]   ;;  %s2666_s4 = inlined_call_operand.vmem [shape: f32[1,256], index: 4, kind: input, shape index: {}]   ;;  %s2667_s5 = inlined_call_operand.hbm [shape: bf16[256,384], index: 5, kind: input, shape index: {}]   ;;  %s2668_s6 = inlined_call_operand.vmem [shape: f32[1,384], index: 6, kind: input, shape index: {}]   ;;  %s2669_s7 = inlined_call_operand.vmem [shape: f32[128,384], index: 7, kind: output, shape index: {}]  }
   0x1   :  { %13 = vsyncpa [#allocation5], 0  ;;  %s2213_s24 = smov [#allocation2]   ;;  %s2165_s28 = scalar_lea.hbm %s2665_s3, 2048 }
   0x2   :  { %s25_s25 = sshll.u32 %s2213_s24, 4  ;;  %p2166_p0 = scmp.ne.s32.totalorder %s2665_s3, %s2165_s28  ;;  %s26_s25 = int_to_ptr.vmem [resolvable:$true] %s25_s25 }
   0x3   :  { %p2169_p1 = scmp.lt.u32.totalorder %s2165_s28, %s2665_s3 }
   0x5   :  { %p2171_p2 = pnand %p2169_p1, %p2166_p0 }
   0x7   :  { %2174 = shalt.err (!%p2171_p2)
}
   0x8   :  { %s2175_s10 = scalar_lea.vmem %s26_s25, 2048  ;;  %p2180_p4 = scmp.lt.s32.totalorder %s26_s25, %s26_s25 }
   0x9   :  { %p2176_p3 = scmp.ne.s32.totalorder %s26_s25, %s2175_s10  ;;  %p2181_p5 = scmp.lt.s32.totalorder %s2175_s10, %s2175_s10 }
   0xb   :  { %p2182_p6 = por %p2181_p5, %p2180_p4 }
   0xd   :  { %p2183_p7 = pnand %p2182_p6, %p2176_p3 }
   0xf   :  { %2186 = shalt.err (!%p2183_p7)
}
  0x10   :  { %s2214_s11 = smov 128   ;;  %s2215_s12 = smov 8  }
  0x11   :  { %31 = dma.hbm_to_vmem [thread:$0]  %s2665_s3, 2048, %s26_s25, [#allocation3], %s2214_s11, %s2214_s11, %s2215_s12  }
  0x12   :  { %s2216_s15 = smov [#allocation4]   ;;  %s2187_s19 = scalar_lea.hbm %s2667_s5, 6144 }
  0x13   :  { %s39_s16 = sshll.u32 %s2216_s15, 4  ;;  %p2188_p8 = scmp.ne.s32.totalorder %s2667_s5, %s2187_s19  ;;  %s40_s16 = int_to_ptr.vmem [resolvable:$true] %s39_s16 }
  0x14   :  { %p2191_p9 = scmp.lt.u32.totalorder %s2187_s19, %s2667_s5 }
  0x16   :  { %p2193_p10 = pnand %p2191_p9, %p2188_p8 }
  0x18   :  { %2196 = shalt.err (!%p2193_p10)
}
  0x19   :  { %s2197_s24 = scalar_lea.vmem %s40_s16, 6144  ;;  %p2202_p12 = scmp.lt.s32.totalorder %s40_s16, %s40_s16 }
  0x1a   :  { %p2198_p11 = scmp.ne.s32.totalorder %s40_s16, %s2197_s24  ;;  %p2203_p13 = scmp.lt.s32.totalorder %s2197_s24, %s2197_s24 }
  0x1c   :  { %p2204_p0 = por %p2203_p13, %p2202_p12 }
  0x1e   :  { %p2205_p1 = pnand %p2204_p0, %p2198_p11 }
  0x20   :  { %2208 = shalt.err (!%p2205_p1)
}
  0x21   :  { %s2217_s3 = smov 192   ;;  %s2218_s25 = smov 12  }
  0x22   :  { %45 = dma.hbm_to_vmem [thread:$0]  %s2667_s5, 6144, %s40_s16, [#allocation5], %s2217_s3, %s2217_s3, %s2218_s25  }
  0x23   :  { %2209 = dma.done.wait [#allocation3], 2048  }
  0x24   :  { %2210 = vsyncadd [#allocation3], 4294965248 }
  0x25   :  { %2211 = dma.done.wait [#allocation5], 6144  }
  0x26   :  { %2212 = vsyncadd [#allocation5], 4294961152  ;;  %v1845_v0 = vld [vmem:[%s2663_s1 + $0x40] sm:$0xff]   ;;  %v1847_v2 = vld [vmem:[%s2663_s1 + $0x48] sm:$0xff]   ;;  %v2219_v48 = vmov 0  }
  0x27   :  { %v1846_v1 = vld [vmem:[%s2663_s1] sm:$0xff]   ;;  %1710 = vmatprep.subr.bf16.mxu0 %v1845_v0  ;;  %v1848_v3 = vld [vmem:[%s2663_s1 + $0x8] sm:$0xff]   ;;  %v1849_v4 = vld [vmem:[%s2663_s1 + $0x50] sm:$0xff]   ;;  %595 = vmatprep.mubr.bf16.mxu1 %v2219_v48 }
  0x28   :  { %1711 = vmatpush3.bf16.msra.mxu0 %v1846_v1  ;;  %v1850_v5 = vld [vmem:[%s2663_s1 + $0x10] sm:$0xff]   ;;  %v1851_v6 = vld [vmem:[%s2663_s1 + $0x58] sm:$0xff]   ;;  %v1853_v8 = vld [vmem:[%s2663_s1 + $0x60] sm:$0xff]  }
  0x29   :  { %1712 = vmatprep.subr.bf16.mxu0 %v1847_v2  ;;  %v1852_v7 = vld [vmem:[%s2663_s1 + $0x18] sm:$0xff]   ;;  %v1854_v9 = vld [vmem:[%s2663_s1 + $0x20] sm:$0xff]   ;;  %v1855_v10 = vld [vmem:[%s2663_s1 + $0x68] sm:$0xff]  }
  0x2a   :  { %v1863_v11 = vld [vmem:[%s2662_s0 + $0x4] ss:$8 sps:$4 sm:$0xff]   ;;  %v1857_v13 = vld [vmem:[%s2663_s1 + $0x70] sm:$0xff]   ;;  %v1859_v15 = vld [vmem:[%s2663_s1 + $0x78] sm:$0xff]  }
  0x2b   :  { %v1856_v12 = vld [vmem:[%s2663_s1 + $0x28] sm:$0xff]   ;;  %318 = vmatprep.mubr.bf16.mxu0 %v1863_v11  ;;  %v1858_v14 = vld [vmem:[%s2663_s1 + $0x30] sm:$0xff]   ;;  %v1860_v16 = vld [vmem:[%s2663_s1 + $0x38] sm:$0xff]  }
  0x2c   :  { %1713 = vmatpush3.bf16.msra.mxu0 %v1848_v3  ;;  %v1885_v17 = vld [vmem:[#allocation2 + $0x4] ss:$8 sps:$4 sm:$0xff]   ;;  %v1887_v18 = vld [vmem:[#allocation2] ss:$8 sps:$4 sm:$0xff]   ;;  %v1888_v20 = vld [vmem:[#allocation2 + $0x14] ss:$8 sps:$4 sm:$0xff]  }
  0x2d   :  { %1714 = vmatprep.subr.bf16.mxu0 %v1849_v4  ;;  %v1861_v19 = vld [vmem:[%s2662_s0] ss:$8 sps:$4 sm:$0xff]   ;;  %v1864_v21 = vld [vmem:[%s2662_s0 + $0x14] ss:$8 sps:$4 sm:$0xff]   ;;  %563 = vmatprep.subr.bf16.mxu1 %v1885_v17  ;;  %v1866_v22 = vld [vmem:[%s2662_s0 + $0x10] ss:$8 sps:$4 sm:$0xff]  }
  0x2e   :  { %564 = vmatpush1.bf16.msra.mxu1 %v1887_v18  ;;  %v1867_v23 = vld [vmem:[%s2662_s0 + $0x24] ss:$8 sps:$4 sm:$0xff]   ;;  %v1869_v24 = vld [vmem:[%s2662_s0 + $0x20] ss:$8 sps:$4 sm:$0xff]   ;;  %v1870_v25 = vld [vmem:[%s2662_s0 + $0x34] ss:$8 sps:$4 sm:$0xff]  }
  0x2f   :  { %565 = vmatprep.subr.bf16.mxu1 %v1888_v20  ;;  %v1872_v26 = vld [vmem:[%s2662_s0 + $0x30] ss:$8 sps:$4 sm:$0xff]   ;;  %v1873_v27 = vld [vmem:[%s2662_s0 + $0x44] ss:$8 sps:$4 sm:$0xff]   ;;  %v1875_v28 = vld [vmem:[%s2662_s0 + $0x40] ss:$8 sps:$4 sm:$0xff]  }
  0x30   :  { %1715 = vmatpush3.bf16.msra.mxu0 %v1850_v5  ;;  %v1876_v29 = vld [vmem:[%s2662_s0 + $0x54] ss:$8 sps:$4 sm:$0xff]   ;;  %v1878_v30 = vld [vmem:[%s2662_s0 + $0x50] ss:$8 sps:$4 sm:$0xff]   ;;  %v1879_v31 = vld [vmem:[%s2662_s0 + $0x64] ss:$8 sps:$4 sm:$0xff]  }
  0x31   :  { %1716 = vmatprep.subr.bf16.mxu0 %v1851_v6  ;;  %v1881_v32 = vld [vmem:[%s2662_s0 + $0x60] ss:$8 sps:$4 sm:$0xff]   ;;  %v1882_v33 = vld [vmem:[%s2662_s0 + $0x74] ss:$8 sps:$4 sm:$0xff]   ;;  %v1884_v34 = vld [vmem:[%s2662_s0 + $0x70] ss:$8 sps:$4 sm:$0xff]  }
  0x32   :  { %v1890_v35 = vld [vmem:[#allocation2 + $0x10] ss:$8 sps:$4 sm:$0xff]   ;;  %v1891_v36 = vld [vmem:[#allocation2 + $0x24] ss:$8 sps:$4 sm:$0xff]   ;;  %v1893_v37 = vld [vmem:[#allocation2 + $0x20] ss:$8 sps:$4 sm:$0xff]  }
  0x33   :  { %566 = vmatpush1.bf16.msra.mxu1 %v1890_v35  ;;  %v1894_v38 = vld [vmem:[#allocation2 + $0x34] ss:$8 sps:$4 sm:$0xff]   ;;  %v1896_v39 = vld [vmem:[#allocation2 + $0x30] ss:$8 sps:$4 sm:$0xff]   ;;  %v1897_v40 = vld [vmem:[#allocation2 + $0x44] ss:$8 sps:$4 sm:$0xff]  }
  0x34   :  { %1717 = vmatpush3.bf16.msra.mxu0 %v1852_v7  ;;  %567 = vmatprep.subr.bf16.mxu1 %v1891_v36  ;;  %v1899_v41 = vld [vmem:[#allocation2 + $0x40] ss:$8 sps:$4 sm:$0xff]   ;;  %v1900_v42 = vld [vmem:[#allocation2 + $0x54] ss:$8 sps:$4 sm:$0xff]   ;;  %v1902_v43 = vld [vmem:[#allocation2 + $0x50] ss:$8 sps:$4 sm:$0xff]  }
  0x35   :  { %1718 = vmatprep.subr.bf16.mxu0 %v1853_v8  ;;  %v1903_v44 = vld [vmem:[#allocation2 + $0x64] ss:$8 sps:$4 sm:$0xff]   ;;  %v1905_v45 = vld [vmem:[#allocation2 + $0x60] ss:$8 sps:$4 sm:$0xff]   ;;  %v1906_v46 = vld [vmem:[#allocation2 + $0x74] ss:$8 sps:$4 sm:$0xff]  }
  0x36   :  { %v1908_v47 = vld [vmem:[#allocation2 + $0x70] ss:$8 sps:$4 sm:$0xff]   ;;  %v1909_v49 = vld [vmem:[#allocation4 + $0xc8] ss:$12 sps:$4 sm:$0xff]   ;;  %v1910_v50 = vld [vmem:[#allocation4] ss:$12 sps:$4 sm:$0xff]  }
  0x37   :  { %568 = vmatpush1.bf16.msra.mxu1 %v1893_v37  ;;  %v1912_v51 = vld [vmem:[#allocation4 + $0x4] ss:$12 sps:$4 sm:$0xff]   ;;  %v1916_v52 = vld [vmem:[#allocation4 + $0x1c] ss:$12 sps:$4 sm:$0xff]   ;;  %v1920_v54 = vld [vmem:[#allocation4 + $0x34] ss:$12 sps:$4 sm:$0xff]  }
  0x38   :  { %1719 = vmatpush3.bf16.msra.mxu0 %v1854_v9  ;;  %569 = vmatprep.subr.bf16.mxu1 %v1894_v38  ;;  %v1914_v53 = vld [vmem:[#allocation4 + $0x18] ss:$12 sps:$4 sm:$0xff]   ;;  %v1918_v55 = vld [vmem:[#allocation4 + $0x30] ss:$12 sps:$4 sm:$0xff]   ;;  %v1922_v57 = vld [vmem:[#allocation4 + $0x48] ss:$12 sps:$4 sm:$0xff]  }
  0x39   :  { %1720 = vmatprep.subr.bf16.mxu0 %v1855_v10  ;;  %v1924_v56 = vld [vmem:[#allocation4 + $0x4c] ss:$12 sps:$4 sm:$0xff]   ;;  %v1928_v58 = vld [vmem:[#allocation4 + $0x64] ss:$12 sps:$4 sm:$0xff]   ;;  %v1932_v60 = vld [vmem:[#allocation4 + $0x7c] ss:$12 sps:$4 sm:$0xff]  }
  0x3a   :  { %v1926_v59 = vld [vmem:[#allocation4 + $0x60] ss:$12 sps:$4 sm:$0xff]   ;;  %v1930_v61 = vld [vmem:[#allocation4 + $0x78] ss:$12 sps:$4 sm:$0xff]   ;;  %v1934_v63 = vld [vmem:[#allocation4 + $0x90] ss:$12 sps:$4 sm:$0xff]  }
  0x3b   :  { %570 = vmatpush1.bf16.msra.mxu1 %v1896_v39  ;;  %v1936_v62 = vld [vmem:[#allocation4 + $0x94] ss:$12 sps:$4 sm:$0xff]   ;;  %v1940_v0 = vld [vmem:[#allocation4 + $0xac] ss:$12 sps:$4 sm:$0xff]   ;;  %v1944_v2 = vld [vmem:[#allocation4 + $0xc4] ss:$12 sps:$4 sm:$0xff]  }
  0x3c   :  { %1721 = vmatpush3.bf16.msra.mxu0 %v1856_v12  ;;  %571 = vmatprep.subr.bf16.mxu1 %v1897_v40  ;;  %v1938_v1 = vld [vmem:[#allocation4 + $0xa8] ss:$12 sps:$4 sm:$0xff]   ;;  %v1942_v3 = vld [vmem:[#allocation4 + $0xc0] ss:$12 sps:$4 sm:$0xff]   ;;  %v1946_v5 = vld [vmem:[#allocation4 + $0xd8] ss:$12 sps:$4 sm:$0xff]  }
  0x3d   :  { %1722 = vmatprep.subr.bf16.mxu0 %v1857_v13  ;;  %v1948_v4 = vld [vmem:[#allocation4 + $0xdc] ss:$12 sps:$4 sm:$0xff]   ;;  %v2384_v7 = vld [vmem:[%s2664_s2] ss:$0 sm:$0xff] }
  0x3f   :  { %572 = vmatpush1.bf16.msra.mxu1 %v1899_v41 }
  0x40   :  { %1723 = vmatpush3.bf16.msra.mxu0 %v1858_v14  ;;  %573 = vmatprep.subr.bf16.mxu1 %v1900_v42 }
  0x41   :  { %1724 = vmatprep.subr.bf16.mxu0 %v1859_v15 }
  0x43   :  { %574 = vmatpush1.bf16.msra.mxu1 %v1902_v43 }
  0x44   :  { %1725 = vmatpush3.bf16.msra.mxu0 %v1860_v16  ;;  %575 = vmatprep.subr.bf16.mxu1 %v1903_v44  ;;  %v1913_v44 = vld [vmem:[#allocation4 + $0x8] ss:$12 sps:$4 sm:$0xff]  }
  0x45   :  { %1157 = vmatprep.subr.bf16.mxu0 %v1912_v51 }
  0x47   :  { %319 = vmatmul.mubr.bf16.vlgmr.msra.gmra.mrb[0].mxu0 %v1861_v19  ;;  %576 = vmatpush1.bf16.msra.mxu1 %v1905_v45 }
  0x48   :  { %326 = vmatprep.mubr.bf16.mxu0 %v1864_v21  ;;  %577 = vmatprep.subr.bf16.mxu1 %v1906_v46 }
  0x49   :  { %1158 = vmatpush1.bf16.msra.mxu0 %v1910_v50 }
  0x4a   :  { %1159 = vmatprep.subr.bf16.mxu0 %v1916_v52 }
  0x4b   :  { %578 = vmatpush1.bf16.msra.mxu1 %v1908_v47  ;;  %v1917_v47 = vld [vmem:[#allocation4 + $0xe0] ss:$12 sps:$4 sm:$0xff]  }
  0x4c   :  { %1774 = vmatprep.subr.bf16.mxu1 %v1909_v49 }
  0x4d   :  { %1160 = vmatpush1.bf16.msra.mxu0 %v1914_v53 }
  0x4e   :  { %1161 = vmatprep.subr.bf16.mxu0 %v1920_v54 }
  0x4f   :  { %327 = vmatmul.mubr.bf16.gmra.mrb[4].mxu0 %v1866_v22 }
  0x50   :  { %334 = vmatprep.mubr.bf16.mxu0 %v1867_v23 }
  0x51   :  { %1162 = vmatpush1.bf16.msra.mxu0 %v1918_v55 }
  0x52   :  { %1163 = vmatprep.subr.bf16.mxu0 %v1924_v56 }
  0x55   :  { %1164 = vmatpush1.bf16.msra.mxu0 %v1922_v57  ;;  %v1921_v57 = vld [vmem:[#allocation4 + $0x20] ss:$12 sps:$4 sm:$0xff]  }
  0x56   :  { %1165 = vmatprep.subr.bf16.mxu0 %v1928_v58 }
  0x57   :  { %335 = vmatmul.mubr.bf16.gmra.mrb[8].mxu0 %v1869_v24 }
  0x58   :  { %342 = vmatprep.mubr.bf16.mxu0 %v1870_v25 }
  0x59   :  { %1166 = vmatpush1.bf16.msra.mxu0 %v1926_v59  ;;  %v1925_v59 = vld [vmem:[#allocation4 + $0xf8] ss:$12 sps:$4 sm:$0xff]  }
  0x5a   :  { %1167 = vmatprep.subr.bf16.mxu0 %v1932_v60 }
  0x5d   :  { %1168 = vmatpush1.bf16.msra.mxu0 %v1930_v61 }
  0x5e   :  { %1169 = vmatprep.subr.bf16.mxu0 %v1936_v62 }
  0x5f   :  { %343 = vmatmul.mubr.bf16.gmra.mrb[12].mxu0 %v1872_v26 }
  0x60   :  { %350 = vmatprep.mubr.bf16.mxu0 %v1873_v27 }
  0x61   :  { %1170 = vmatpush1.bf16.msra.mxu0 %v1934_v63 }
  0x62   :  { %1171 = vmatprep.subr.bf16.mxu0 %v1940_v0 }
  0x65   :  { %1172 = vmatpush1.bf16.msra.mxu0 %v1938_v1 }
  0x66   :  { %1173 = vmatprep.subr.bf16.mxu0 %v1944_v2  ;;  %v1929_v2 = vld [vmem:[#allocation4 + $0x38] ss:$12 sps:$4 sm:$0xff]  }
  0x67   :  { %351 = vmatmul.mubr.bf16.gmra.mrb[16].mxu0 %v1875_v28 }
  0x68   :  { %358 = vmatprep.mubr.bf16.mxu0 %v1876_v29 }
  0x69   :  { %1174 = vmatpush1.bf16.msra.mxu0 %v1942_v3 }
  0x6a   :  { %1175 = vmatprep.subr.bf16.mxu0 %v1948_v4 }
  0x6d   :  { %1176 = vmatpush1.bf16.msra.mxu0 %v1946_v5  ;;  %v1933_v5 = vld [vmem:[#allocation4 + $0x110] ss:$12 sps:$4 sm:$0xff]  }
  0x6f   :  { %359 = vmatmul.mubr.bf16.gmra.mrb[20].mxu0 %v1878_v30 }
  0x70   :  { %366 = vmatprep.mubr.bf16.mxu0 %v1879_v31 }
  0x77   :  { %367 = vmatmul.mubr.bf16.gmra.mrb[24].mxu0 %v1881_v32 }
  0x78   :  { %374 = vmatprep.mubr.bf16.mxu0 %v1882_v33 }
  0x7f   :  { %375 = vmatmul.mubr.bf16.gmra.mrb[28].mxu0 %v1884_v34 }
 0x11a   :  { %v1726_v6 = vpop.f32.mrb[0].mxu0 }
 0x11b   :  { %v1727_v8 = vpop.f32.mrb[1].mxu0 }
 0x11c   :  { %v1728_v9 = vadd.f32 %v1727_v8, %v1726_v6  ;;  %v1729_v10 = vpop.f32.mrb[2].mxu0 }
 0x11d   :  { %v1730_v11 = vpop.f32.mrb[3].mxu0 }
 0x11e   :  { %v321_v12 = vadd.f32 %v1728_v9, %v2384_v7  ;;  %v1731_v13 = vadd.f32 %v1730_v11, %v1729_v10 }
 0x120   :  { %v383_v14 = vmul.f32 0.5, %v321_v12  ;;  %v324_v15 = vadd.f32 %v1731_v13, %v2384_v7 }
 0x122   :  { %1973 = vtanh.f32 %v383_v14  ;;  %v384_v16 = vmul.f32 0.5, %v324_v15  ;;  %v1732_v17 = vpop.f32.mrb[4].mxu0  ;;  %v1937_v15 = vld [vmem:[#allocation4 + $0x50] ss:$12 sps:$4 sm:$0xff]  }
 0x123   :  { %v1733_v18 = vpop.f32.mrb[5].mxu0 }
 0x124   :  { %1975 = vtanh.f32 %v384_v16  ;;  %v1734_v19 = vadd.f32 %v1733_v18, %v1732_v17  ;;  %v1735_v20 = vpop.f32.mrb[6].mxu0  ;;  %v1941_v17 = vld [vmem:[#allocation4 + $0x128] ss:$12 sps:$4 sm:$0xff]  }
 0x125   :  { %v1736_v21 = vpop.f32.mrb[7].mxu0 }
 0x126   :  { %v329_v22 = vadd.f32 %v1734_v19, %v2384_v7  ;;  %v1737_v23 = vadd.f32 %v1736_v21, %v1735_v20 }
 0x128   :  { %v385_v24 = vmul.f32 0.5, %v329_v22  ;;  %v332_v25 = vadd.f32 %v1737_v23, %v2384_v7 }
 0x12a   :  { %1977 = vtanh.f32 %v385_v24  ;;  %v386_v26 = vmul.f32 0.5, %v332_v25  ;;  %v1738_v27 = vpop.f32.mrb[8].mxu0  ;;  %v1945_v24 = vld [vmem:[#allocation4 + $0x68] ss:$12 sps:$4 sm:$0xff]  }
 0x12b   :  { %v1739_v28 = vpop.f32.mrb[9].mxu0 }
 0x12c   :  { %v1974_v29 = vpop.eup %1973  ;;  %1979 = vtanh.f32 %v386_v26  ;;  %v1740_v30 = vadd.f32 %v1739_v28, %v1738_v27  ;;  %v1741_v31 = vpop.f32.mrb[10].mxu0 }
 0x12d   :  { %v415_v32 = vadd.f32 1.0, %v1974_v29  ;;  %v1742_v33 = vpop.f32.mrb[11].mxu0 }
 0x12e   :  { %v1976_v34 = vpop.eup %1975  ;;  %v337_v35 = vadd.f32 %v1740_v30, %v2384_v7  ;;  %v1743_v36 = vadd.f32 %v1742_v33, %v1741_v31 }
 0x12f   :  { %v416_v37 = vadd.f32 1.0, %v1976_v34  ;;  %v431_v40 = vmul.f32 0.5, %v415_v32 }
 0x130   :  { %v387_v38 = vmul.f32 0.5, %v337_v35  ;;  %v340_v39 = vadd.f32 %v1743_v36, %v2384_v7 }
 0x131   :  { %v432_v41 = vmul.f32 0.5, %v416_v37 }
 0x132   :  { %1981 = vtanh.f32 %v387_v38  ;;  %v388_v42 = vmul.f32 0.5, %v340_v39  ;;  %v1744_v43 = vpop.f32.mrb[12].mxu0 }
 0x133   :  { %v1745_v45 = vpop.f32.mrb[13].mxu0  ;;  %v447_v46 = vpack.c.bf16 %v432_v41, %v431_v40 }
 0x134   :  { %v1978_v49 = vpop.eup %1977  ;;  %1983 = vtanh.f32 %v388_v42  ;;  %v1746_v50 = vadd.f32 %v1745_v45, %v1744_v43  ;;  %v1747_v51 = vpop.f32.mrb[14].mxu0 }
 0x135   :  { %v417_v52 = vadd.f32 1.0, %v1978_v49  ;;  %v1748_v53 = vpop.f32.mrb[15].mxu0  ;;  %596 = vmatmul.mubr.bf16.vlgmr.msra.gmra.mrb[0].mxu1 %v447_v46 }
 0x136   :  { %v1980_v54 = vpop.eup %1979  ;;  %v345_v55 = vadd.f32 %v1746_v50, %v2384_v7  ;;  %v1749_v56 = vadd.f32 %v1748_v53, %v1747_v51  ;;  %605 = vmatprep.mubr.bf16.mxu1 %v2219_v48  ;;  %1775 = vmatpush3.bf16.msra.mxu1 %v1913_v44 }
 0x137   :  { %v418_v58 = vadd.f32 1.0, %v1980_v54  ;;  %1776 = vmatprep.subr.bf16.mxu1 %v1917_v47  ;;  %v433_v62 = vmul.f32 0.5, %v417_v52 }
 0x138   :  { %v389_v60 = vmul.f32 0.5, %v345_v55  ;;  %v348_v61 = vadd.f32 %v1749_v56, %v2384_v7 }
 0x139   :  { %v434_v63 = vmul.f32 0.5, %v418_v58 }
 0x13a   :  { %1985 = vtanh.f32 %v389_v60  ;;  %v390_v0 = vmul.f32 0.5, %v348_v61  ;;  %v1750_v1 = vpop.f32.mrb[16].mxu0  ;;  %1777 = vmatpush3.bf16.msra.mxu1 %v1921_v57 }
 0x13b   :  { %v1751_v3 = vpop.f32.mrb[17].mxu0  ;;  %v448_v4 = vpack.c.bf16 %v434_v63, %v433_v62  ;;  %1778 = vmatprep.subr.bf16.mxu1 %v1925_v59 }
 0x13c   :  { %v1982_v6 = vpop.eup %1981  ;;  %1987 = vtanh.f32 %v390_v0  ;;  %v1752_v8 = vadd.f32 %v1751_v3, %v1750_v1  ;;  %v1753_v9 = vpop.f32.mrb[18].mxu0 }
 0x13d   :  { %v419_v10 = vadd.f32 1.0, %v1982_v6  ;;  %v1754_v11 = vpop.f32.mrb[19].mxu0  ;;  %606 = vmatmul.mubr.bf16.gmra.mrb[4].mxu1 %v448_v4 }
 0x13e   :  { %v1984_v12 = vpop.eup %1983  ;;  %v353_v13 = vadd.f32 %v1752_v8, %v2384_v7  ;;  %v1755_v14 = vadd.f32 %v1754_v11, %v1753_v9  ;;  %615 = vmatprep.mubr.bf16.mxu1 %v2219_v48  ;;  %1779 = vmatpush3.bf16.msra.mxu1 %v1929_v2 }
 0x13f   :  { %v420_v16 = vadd.f32 1.0, %v1984_v12  ;;  %1780 = vmatprep.subr.bf16.mxu1 %v1933_v5  ;;  %v435_v20 = vmul.f32 0.5, %v419_v10 }
 0x140   :  { %v391_v18 = vmul.f32 0.5, %v353_v13  ;;  %v356_v19 = vadd.f32 %v1755_v14, %v2384_v7 }
 0x141   :  { %v436_v21 = vmul.f32 0.5, %v420_v16 }
 0x142   :  { %1989 = vtanh.f32 %v391_v18  ;;  %v392_v22 = vmul.f32 0.5, %v356_v19  ;;  %v1756_v23 = vpop.f32.mrb[20].mxu0  ;;  %1781 = vmatpush3.bf16.msra.mxu1 %v1937_v15 }
 0x143   :  { %v1757_v25 = vpop.f32.mrb[21].mxu0  ;;  %v449_v26 = vpack.c.bf16 %v436_v21, %v435_v20  ;;  %1782 = vmatprep.subr.bf16.mxu1 %v1941_v17 }
 0x144   :  { %v1986_v27 = vpop.eup %1985  ;;  %1991 = vtanh.f32 %v392_v22  ;;  %v1758_v28 = vadd.f32 %v1757_v25, %v1756_v23  ;;  %v1759_v29 = vpop.f32.mrb[22].mxu0 }
 0x145   :  { %v421_v30 = vadd.f32 1.0, %v1986_v27  ;;  %v1760_v31 = vpop.f32.mrb[23].mxu0  ;;  %616 = vmatmul.mubr.bf16.gmra.mrb[8].mxu1 %v449_v26  ;;  %v1952_v27 = vld [vmem:[#allocation4 + $0xf4] ss:$12 sps:$4 sm:$0xff]  }
 0x146   :  { %v1988_v32 = vpop.eup %1987  ;;  %v361_v33 = vadd.f32 %v1758_v28, %v2384_v7  ;;  %v1761_v34 = vadd.f32 %v1760_v31, %v1759_v29  ;;  %625 = vmatprep.mubr.bf16.mxu1 %v2219_v48  ;;  %1783 = vmatpush3.bf16.msra.mxu1 %v1945_v24  ;;  %v1950_v28 = vld [vmem:[#allocation4 + $0xf0] ss:$12 sps:$4 sm:$0xff]   ;;  %v1956_v29 = vld [vmem:[#allocation4 + $0x10c] ss:$12 sps:$4 sm:$0xff]  }
 0x147   :  { %v422_v35 = vadd.f32 1.0, %v1988_v32  ;;  %v437_v38 = vmul.f32 0.5, %v421_v30  ;;  %1177 = vmatprep.subr.bf16.mxu0 %v1952_v27  ;;  %v1954_v30 = vld [vmem:[#allocation4 + $0x108] ss:$12 sps:$4 sm:$0xff]   ;;  %v1960_v31 = vld [vmem:[#allocation4 + $0x124] ss:$12 sps:$4 sm:$0xff]  }
 0x148   :  { %v393_v36 = vmul.f32 0.5, %v361_v33  ;;  %v364_v37 = vadd.f32 %v1761_v34, %v2384_v7  ;;  %1178 = vmatpush1.bf16.msra.mxu0 %v1950_v28  ;;  %v1958_v32 = vld [vmem:[#allocation4 + $0x120] ss:$12 sps:$4 sm:$0xff]   ;;  %v1964_v34 = vld [vmem:[#allocation4 + $0x13c] ss:$12 sps:$4 sm:$0xff]  }
 0x149   :  { %v438_v39 = vmul.f32 0.5, %v422_v35  ;;  %1179 = vmatprep.subr.bf16.mxu0 %v1956_v29  ;;  %v1949_v33 = vld [vmem:[#allocation4 + $0x140] ss:$12 sps:$4 sm:$0xff]   ;;  %v1962_v35 = vld [vmem:[#allocation4 + $0x138] ss:$12 sps:$4 sm:$0xff]  }
 0x14a   :  { %1993 = vtanh.f32 %v393_v36  ;;  %v394_v40 = vmul.f32 0.5, %v364_v37  ;;  %v1762_v41 = vpop.f32.mrb[24].mxu0  ;;  %1784 = vmatprep.subr.bf16.mxu1 %v1949_v33  ;;  %v1957_v36 = vld [vmem:[#allocation4 + $0x158] ss:$12 sps:$4 sm:$0xff]   ;;  %v1968_v37 = vld [vmem:[#allocation4 + $0x154] ss:$12 sps:$4 sm:$0xff]  }
 0x14b   :  { %v1763_v42 = vpop.f32.mrb[25].mxu0  ;;  %v450_v43 = vpack.c.bf16 %v438_v39, %v437_v38  ;;  %v1961_v38 = vld [vmem:[#allocation4 + $0x98] ss:$12 sps:$4 sm:$0xff]   ;;  %v1966_v39 = vld [vmem:[#allocation4 + $0x150] ss:$12 sps:$4 sm:$0xff]  }
 0x14c   :  { %v1990_v44 = vpop.eup %1989  ;;  %1995 = vtanh.f32 %v394_v40  ;;  %v1764_v45 = vadd.f32 %v1763_v42, %v1762_v41  ;;  %v1765_v46 = vpop.f32.mrb[26].mxu0  ;;  %1180 = vmatpush1.bf16.msra.mxu0 %v1954_v30  ;;  %v1965_v40 = vld [vmem:[#allocation4 + $0x170] ss:$12 sps:$4 sm:$0xff]   ;;  %v1972_v41 = vld [vmem:[#allocation4 + $0x16c] ss:$12 sps:$4 sm:$0xff]  }
 0x14d   :  { %v423_v47 = vadd.f32 1.0, %v1990_v44  ;;  %v1766_v49 = vpop.f32.mrb[27].mxu0  ;;  %626 = vmatmul.mubr.bf16.gmra.mrb[12].mxu1 %v450_v43  ;;  %1181 = vmatprep.subr.bf16.mxu0 %v1960_v31  ;;  %v1969_v42 = vld [vmem:[#allocation4 + $0xb0] ss:$12 sps:$4 sm:$0xff]   ;;  %v1970_v43 = vld [vmem:[#allocation4 + $0x168] ss:$12 sps:$4 sm:$0xff]   ;;  %v473_v44 = vlaneseq }
 0x14e   :  { %v1992_v50 = vpop.eup %1991  ;;  %v369_v51 = vadd.f32 %v1764_v45, %v2384_v7  ;;  %v1767_v52 = vadd.f32 %v1766_v49, %v1765_v46  ;;  %635 = vmatprep.mubr.bf16.mxu1 %v2219_v48 }
 0x14f   :  { %v424_v53 = vadd.f32 1.0, %v1992_v50  ;;  %v439_v56 = vmul.f32 0.5, %v423_v47  ;;  %v2409_v45 = vshrl.u32 %v473_v44, 7  ;;  %v471_v47 = vld [vmem:[%s2666_s4] sm:$0x3] }
 0x150   :  { %v395_v54 = vmul.f32 0.5, %v369_v51  ;;  %v372_v55 = vadd.f32 %v1767_v52, %v2384_v7  ;;  %1182 = vmatpush1.bf16.msra.mxu0 %v1958_v32 }
 0x151   :  { %v440_v57 = vmul.f32 0.5, %v424_v53  ;;  %1183 = vmatprep.subr.bf16.mxu0 %v1964_v34  ;;  %v475_v46 = vsub.s32 0, %v2409_v45  ;;  %v479_v49 = vsub.s32 1, %v2409_v45 }
 0x152   :  { %1997 = vtanh.f32 %v395_v54  ;;  %v396_v58 = vmul.f32 0.5, %v372_v55  ;;  %v1768_v59 = vpop.f32.mrb[28].mxu0 }
 0x153   :  { %v1769_v60 = vpop.f32.mrb[29].mxu0  ;;  %v451_v61 = vpack.c.bf16 %v440_v57, %v439_v56  ;;  %v2418_v50 = vrot.slane %v471_v47, %v475_v46  ;;  %v2422_v51 = vrot.slane %v471_v47, %v479_v49 }
 0x154   :  { %v1994_v62 = vpop.eup %1993  ;;  %1999 = vtanh.f32 %v396_v58  ;;  %v1770_v63 = vadd.f32 %v1769_v60, %v1768_v59  ;;  %v1771_v0 = vpop.f32.mrb[30].mxu0  ;;  %1184 = vmatpush1.bf16.msra.mxu0 %v1962_v35 }
 0x155   :  { %v425_v1 = vadd.f32 1.0, %v1994_v62  ;;  %v1772_v2 = vpop.f32.mrb[31].mxu0  ;;  %636 = vmatmul.mubr.bf16.gmra.mrb[16].mxu1 %v451_v61  ;;  %1185 = vmatprep.subr.bf16.mxu0 %v1968_v37 }
 0x156   :  { %v1996_v3 = vpop.eup %1995  ;;  %v377_v4 = vadd.f32 %v1770_v63, %v2384_v7  ;;  %v1773_v5 = vadd.f32 %v1772_v2, %v1771_v0  ;;  %645 = vmatprep.mubr.bf16.mxu1 %v2219_v48 }
 0x157   :  { %v426_v6 = vadd.f32 1.0, %v1996_v3  ;;  %v441_v10 = vmul.f32 0.5, %v425_v1 }
 0x158   :  { %v397_v8 = vmul.f32 0.5, %v377_v4  ;;  %v380_v9 = vadd.f32 %v1773_v5, %v2384_v7  ;;  %1186 = vmatpush1.bf16.msra.mxu0 %v1966_v39 }
 0x159   :  { %v442_v11 = vmul.f32 0.5, %v426_v6  ;;  %1187 = vmatprep.subr.bf16.mxu0 %v1972_v41 }
 0x15a   :  { %2001 = vtanh.f32 %v397_v8  ;;  %v398_v12 = vmul.f32 0.5, %v380_v9 }
 0x15b   :  { %v452_v13 = vpack.c.bf16 %v442_v11, %v441_v10 }
 0x15c   :  { %v1998_v14 = vpop.eup %1997  ;;  %2003 = vtanh.f32 %v398_v12  ;;  %1188 = vmatpush1.bf16.msra.mxu0 %v1970_v43 }
 0x15d   :  { %v427_v15 = vadd.f32 1.0, %v1998_v14  ;;  %646 = vmatmul.mubr.bf16.gmra.mrb[20].mxu1 %v452_v13 }
 0x15e   :  { %v2000_v16 = vpop.eup %1999  ;;  %655 = vmatprep.mubr.bf16.mxu1 %v2219_v48 }
 0x15f   :  { %v428_v17 = vadd.f32 1.0, %v2000_v16  ;;  %v443_v18 = vmul.f32 0.5, %v427_v15 }
 0x161   :  { %v444_v19 = vmul.f32 0.5, %v428_v17 }
 0x163   :  { %v453_v20 = vpack.c.bf16 %v444_v19, %v443_v18 }
 0x164   :  { %v2002_v21 = vpop.eup %2001 }
 0x165   :  { %v429_v22 = vadd.f32 1.0, %v2002_v21  ;;  %656 = vmatmul.mubr.bf16.gmra.mrb[24].mxu1 %v453_v20 }
 0x166   :  { %v2004_v7 = vpop.eup %2003  ;;  %665 = vmatprep.mubr.bf16.mxu1 %v2219_v48  ;;  %v1953_v48 = vld [vmem:[#allocation4 + $0x80] ss:$12 sps:$4 sm:$0xff]  }
 0x167   :  { %v430_v23 = vadd.f32 1.0, %v2004_v7  ;;  %v445_v24 = vmul.f32 0.5, %v429_v22  ;;  %1785 = vmatpush3.bf16.msra.mxu1 %v1953_v48 }
 0x168   :  { %1786 = vmatprep.subr.bf16.mxu1 %v1957_v36 }
 0x169   :  { %v446_v25 = vmul.f32 0.5, %v430_v23 }
 0x16b   :  { %v454_v26 = vpack.c.bf16 %v446_v25, %v445_v24  ;;  %1787 = vmatpush3.bf16.msra.mxu1 %v1961_v38 }
 0x16c   :  { %1788 = vmatprep.subr.bf16.mxu1 %v1965_v40 }
 0x16d   :  { %666 = vmatmul.mubr.bf16.gmra.mrb[28].mxu1 %v454_v26 }
 0x16f   :  { %1789 = vmatpush3.bf16.msra.mxu1 %v1969_v42 }
 0x208   :  { %v597_v52 = vpop.f32.mrb[0].mxu1 }
 0x209   :  { %v598_v53 = vadd.f32 %v597_v52, %v2418_v50  ;;  %v599_v54 = vpop.f32.mrb[1].mxu1 }
 0x20a   :  { %v600_v55 = vadd.f32 %v599_v54, %v2422_v51  ;;  %v601_v56 = vpop.f32.mrb[2].mxu1 }
 0x20b   :  { %v676_v57 = vmul.f32 0.5, %v598_v53  ;;  %v602_v58 = vadd.f32 %v601_v56, %v2418_v50  ;;  %v603_v59 = vpop.f32.mrb[3].mxu1 }
 0x20c   :  { %v677_v60 = vmul.f32 0.5, %v600_v55  ;;  %v604_v61 = vadd.f32 %v603_v59, %v2422_v51 }
 0x20d   :  { %2005 = vtanh.f32 %v676_v57  ;;  %v678_v62 = vmul.f32 0.5, %v602_v58 }
 0x20e   :  { %2007 = vtanh.f32 %v677_v60  ;;  %v679_v63 = vmul.f32 0.5, %v604_v61 }
 0x20f   :  { %2009 = vtanh.f32 %v678_v62 }
 0x210   :  { %2011 = vtanh.f32 %v679_v63  ;;  %v607_v0 = vpop.f32.mrb[4].mxu1 }
 0x211   :  { %v608_v1 = vadd.f32 %v607_v0, %v2418_v50  ;;  %v609_v2 = vpop.f32.mrb[5].mxu1 }
 0x212   :  { %v610_v3 = vadd.f32 %v609_v2, %v2422_v51  ;;  %v611_v4 = vpop.f32.mrb[6].mxu1 }
 0x213   :  { %v680_v5 = vmul.f32 0.5, %v608_v1  ;;  %v612_v6 = vadd.f32 %v611_v4, %v2418_v50  ;;  %v613_v8 = vpop.f32.mrb[7].mxu1 }
 0x214   :  { %v681_v9 = vmul.f32 0.5, %v610_v3  ;;  %v614_v10 = vadd.f32 %v613_v8, %v2422_v51 }
 0x215   :  { %2013 = vtanh.f32 %v680_v5  ;;  %v682_v11 = vmul.f32 0.5, %v612_v6 }
 0x216   :  { %2015 = vtanh.f32 %v681_v9  ;;  %v683_v12 = vmul.f32 0.5, %v614_v10 }
 0x217   :  { %v2006_v13 = vpop.eup %2005  ;;  %2017 = vtanh.f32 %v682_v11 }
 0x218   :  { %v2008_v14 = vpop.eup %2007  ;;  %v740_v15 = vadd.f32 1.0, %v2006_v13  ;;  %2019 = vtanh.f32 %v683_v12  ;;  %v617_v16 = vpop.f32.mrb[8].mxu1 }
 0x219   :  { %v2010_v17 = vpop.eup %2009  ;;  %v741_v18 = vadd.f32 1.0, %v2008_v14  ;;  %v618_v19 = vadd.f32 %v617_v16, %v2418_v50  ;;  %v619_v20 = vpop.f32.mrb[9].mxu1 }
 0x21a   :  { %v2012_v21 = vpop.eup %2011  ;;  %v742_v22 = vadd.f32 1.0, %v2010_v17  ;;  %v620_v7 = vadd.f32 %v619_v20, %v2422_v51  ;;  %v621_v23 = vpop.f32.mrb[10].mxu1  ;;  %v772_v28 = vmul.f32 0.5, %v740_v15 }
 0x21b   :  { %v743_v24 = vadd.f32 1.0, %v2012_v21  ;;  %v684_v25 = vmul.f32 0.5, %v618_v19  ;;  %v622_v26 = vadd.f32 %v621_v23, %v2418_v50  ;;  %v623_v27 = vpop.f32.mrb[11].mxu1  ;;  %v773_v32 = vmul.f32 0.5, %v741_v18 }
 0x21c   :  { %v774_v29 = vmul.f32 0.5, %v742_v22  ;;  %v685_v30 = vmul.f32 0.5, %v620_v7  ;;  %v624_v31 = vadd.f32 %v623_v27, %v2422_v51 }
 0x21d   :  { %v775_v33 = vmul.f32 0.5, %v743_v24  ;;  %2021 = vtanh.f32 %v684_v25  ;;  %v686_v34 = vmul.f32 0.5, %v622_v26 }
 0x21e   :  { %v804_v48 = vpack.c.bf16 %v774_v29, %v772_v28  ;;  %2023 = vtanh.f32 %v685_v30  ;;  %v687_v35 = vmul.f32 0.5, %v624_v31 }
 0x21f   :  { %v2014_v36 = vpop.eup %2013  ;;  %2025 = vtanh.f32 %v686_v34  ;;  %v805_v37 = vpack.c.bf16 %v775_v33, %v773_v32 }
 0x220   :  { %v2016_v38 = vpop.eup %2015  ;;  %v744_v39 = vadd.f32 1.0, %v2014_v36  ;;  %2027 = vtanh.f32 %v687_v35  ;;  %v627_v40 = vpop.f32.mrb[12].mxu1 }
 0x221   :  { %v2018_v41 = vpop.eup %2017  ;;  %v745_v42 = vadd.f32 1.0, %v2016_v38  ;;  %v628_v43 = vadd.f32 %v627_v40, %v2418_v50  ;;  %v629_v44 = vpop.f32.mrb[13].mxu1  ;;  %1189 = vmatprep.mubr.bf16.mxu0 %v805_v37  ;;  %1302 = vmatprep.mubr.bf16.mxu1 %v805_v37 }
 0x222   :  { %v2020_v47 = vpop.eup %2019  ;;  %v746_v52 = vadd.f32 1.0, %v2018_v41  ;;  %v630_v53 = vadd.f32 %v629_v44, %v2422_v51  ;;  %v631_v54 = vpop.f32.mrb[14].mxu1  ;;  %1190 = vmatmul.mubr.bf16.vlgmr.msra.gmra.mrb[32].mxu0 %v804_v48  ;;  %1303 = vmatmul.mubr.bf16.vlgmr.msra.gmra.mrb[32].mxu1 %v804_v48  ;;  %v776_v59 = vmul.f32 0.5, %v744_v39 }
 0x223   :  { %v747_v55 = vadd.f32 1.0, %v2020_v47  ;;  %v688_v56 = vmul.f32 0.5, %v628_v43  ;;  %v632_v57 = vadd.f32 %v631_v54, %v2418_v50  ;;  %v633_v58 = vpop.f32.mrb[15].mxu1  ;;  %v777_v63 = vmul.f32 0.5, %v745_v42 }
 0x224   :  { %v778_v60 = vmul.f32 0.5, %v746_v52  ;;  %v689_v61 = vmul.f32 0.5, %v630_v53  ;;  %v634_v62 = vadd.f32 %v633_v58, %v2422_v51 }
 0x225   :  { %v779_v0 = vmul.f32 0.5, %v747_v55  ;;  %2029 = vtanh.f32 %v688_v56  ;;  %v690_v1 = vmul.f32 0.5, %v632_v57 }
 0x226   :  { %2031 = vtanh.f32 %v689_v61  ;;  %v691_v2 = vmul.f32 0.5, %v634_v62  ;;  %v806_v3 = vpack.c.bf16 %v778_v60, %v776_v59 }
 0x227   :  { %v2022_v4 = vpop.eup %2021  ;;  %2033 = vtanh.f32 %v690_v1  ;;  %v807_v5 = vpack.c.bf16 %v779_v0, %v777_v63 }
 0x228   :  { %v2024_v6 = vpop.eup %2023  ;;  %v748_v8 = vadd.f32 1.0, %v2022_v4  ;;  %2035 = vtanh.f32 %v691_v2  ;;  %v637_v9 = vpop.f32.mrb[16].mxu1 }
 0x229   :  { %v2026_v10 = vpop.eup %2025  ;;  %v749_v11 = vadd.f32 1.0, %v2024_v6  ;;  %v638_v12 = vadd.f32 %v637_v9, %v2418_v50  ;;  %v639_v13 = vpop.f32.mrb[17].mxu1  ;;  %1199 = vmatprep.mubr.bf16.mxu0 %v807_v5  ;;  %1310 = vmatprep.mubr.bf16.mxu1 %v807_v5 }
 0x22a   :  { %v2028_v14 = vpop.eup %2027  ;;  %v750_v15 = vadd.f32 1.0, %v2026_v10  ;;  %v640_v16 = vadd.f32 %v639_v13, %v2422_v51  ;;  %v641_v17 = vpop.f32.mrb[18].mxu1  ;;  %1200 = vmatmul.mubr.bf16.gmra.mrb[36].mxu0 %v806_v3  ;;  %1311 = vmatmul.mubr.bf16.gmra.mrb[36].mxu1 %v806_v3  ;;  %v780_v22 = vmul.f32 0.5, %v748_v8 }
 0x22b   :  { %v751_v18 = vadd.f32 1.0, %v2028_v14  ;;  %v692_v19 = vmul.f32 0.5, %v638_v12  ;;  %v642_v20 = vadd.f32 %v641_v17, %v2418_v50  ;;  %v643_v21 = vpop.f32.mrb[19].mxu1  ;;  %v781_v25 = vmul.f32 0.5, %v749_v11 }
 0x22c   :  { %v782_v7 = vmul.f32 0.5, %v750_v15  ;;  %v693_v23 = vmul.f32 0.5, %v640_v16  ;;  %v644_v24 = vadd.f32 %v643_v21, %v2422_v51 }
 0x22d   :  { %v783_v26 = vmul.f32 0.5, %v751_v18  ;;  %2037 = vtanh.f32 %v692_v19  ;;  %v694_v27 = vmul.f32 0.5, %v642_v20 }
 0x22e   :  { %2039 = vtanh.f32 %v693_v23  ;;  %v695_v28 = vmul.f32 0.5, %v644_v24  ;;  %v808_v29 = vpack.c.bf16 %v782_v7, %v780_v22 }
 0x22f   :  { %v2030_v30 = vpop.eup %2029  ;;  %2041 = vtanh.f32 %v694_v27  ;;  %v809_v31 = vpack.c.bf16 %v783_v26, %v781_v25 }
 0x230   :  { %v2032_v32 = vpop.eup %2031  ;;  %v752_v33 = vadd.f32 1.0, %v2030_v30  ;;  %2043 = vtanh.f32 %v695_v28  ;;  %v647_v34 = vpop.f32.mrb[20].mxu1 }
 0x231   :  { %v2034_v48 = vpop.eup %2033  ;;  %v753_v35 = vadd.f32 1.0, %v2032_v32  ;;  %v648_v36 = vadd.f32 %v647_v34, %v2418_v50  ;;  %v649_v37 = vpop.f32.mrb[21].mxu1  ;;  %1209 = vmatprep.mubr.bf16.mxu0 %v809_v31  ;;  %1318 = vmatprep.mubr.bf16.mxu1 %v809_v31 }
 0x232   :  { %v2036_v38 = vpop.eup %2035  ;;  %v754_v39 = vadd.f32 1.0, %v2034_v48  ;;  %v650_v40 = vadd.f32 %v649_v37, %v2422_v51  ;;  %v651_v41 = vpop.f32.mrb[22].mxu1  ;;  %1210 = vmatmul.mubr.bf16.gmra.mrb[40].mxu0 %v808_v29  ;;  %1319 = vmatmul.mubr.bf16.gmra.mrb[40].mxu1 %v808_v29  ;;  %v784_v52 = vmul.f32 0.5, %v752_v33 }
 0x233   :  { %v755_v42 = vadd.f32 1.0, %v2036_v38  ;;  %v696_v43 = vmul.f32 0.5, %v648_v36  ;;  %v652_v44 = vadd.f32 %v651_v41, %v2418_v50  ;;  %v653_v47 = vpop.f32.mrb[23].mxu1  ;;  %v785_v56 = vmul.f32 0.5, %v753_v35 }
 0x234   :  { %v786_v53 = vmul.f32 0.5, %v754_v39  ;;  %v697_v54 = vmul.f32 0.5, %v650_v40  ;;  %v654_v55 = vadd.f32 %v653_v47, %v2422_v51 }
 0x235   :  { %v787_v57 = vmul.f32 0.5, %v755_v42  ;;  %2045 = vtanh.f32 %v696_v43  ;;  %v698_v58 = vmul.f32 0.5, %v652_v44 }
 0x236   :  { %2047 = vtanh.f32 %v697_v54  ;;  %v699_v59 = vmul.f32 0.5, %v654_v55  ;;  %v810_v60 = vpack.c.bf16 %v786_v53, %v784_v52 }
 0x237   :  { %v2038_v61 = vpop.eup %2037  ;;  %2049 = vtanh.f32 %v698_v58  ;;  %v811_v62 = vpack.c.bf16 %v787_v57, %v785_v56 }
 0x238   :  { %v2040_v63 = vpop.eup %2039  ;;  %v756_v0 = vadd.f32 1.0, %v2038_v61  ;;  %2051 = vtanh.f32 %v699_v59  ;;  %v657_v1 = vpop.f32.mrb[24].mxu1 }
 0x239   :  { %v2042_v2 = vpop.eup %2041  ;;  %v757_v3 = vadd.f32 1.0, %v2040_v63  ;;  %v658_v4 = vadd.f32 %v657_v1, %v2418_v50  ;;  %v659_v5 = vpop.f32.mrb[25].mxu1  ;;  %1219 = vmatprep.mubr.bf16.mxu0 %v811_v62  ;;  %1326 = vmatprep.mubr.bf16.mxu1 %v811_v62 }
 0x23a   :  { %v2044_v6 = vpop.eup %2043  ;;  %v758_v8 = vadd.f32 1.0, %v2042_v2  ;;  %v660_v9 = vadd.f32 %v659_v5, %v2422_v51  ;;  %v661_v10 = vpop.f32.mrb[26].mxu1  ;;  %1220 = vmatmul.mubr.bf16.gmra.mrb[44].mxu0 %v810_v60  ;;  %1327 = vmatmul.mubr.bf16.gmra.mrb[44].mxu1 %v810_v60  ;;  %v788_v15 = vmul.f32 0.5, %v756_v0 }
 0x23b   :  { %v759_v11 = vadd.f32 1.0, %v2044_v6  ;;  %v700_v12 = vmul.f32 0.5, %v658_v4  ;;  %v662_v13 = vadd.f32 %v661_v10, %v2418_v50  ;;  %v663_v14 = vpop.f32.mrb[27].mxu1  ;;  %v789_v19 = vmul.f32 0.5, %v757_v3 }
 0x23c   :  { %v790_v16 = vmul.f32 0.5, %v758_v8  ;;  %v701_v17 = vmul.f32 0.5, %v660_v9  ;;  %v664_v18 = vadd.f32 %v663_v14, %v2422_v51 }
 0x23d   :  { %v791_v20 = vmul.f32 0.5, %v759_v11  ;;  %2053 = vtanh.f32 %v700_v12  ;;  %v702_v21 = vmul.f32 0.5, %v662_v13 }
 0x23e   :  { %2055 = vtanh.f32 %v701_v17  ;;  %v703_v22 = vmul.f32 0.5, %v664_v18  ;;  %v812_v7 = vpack.c.bf16 %v790_v16, %v788_v15  ;;  %v884_v18 = vld [vmem:[%s2668_s6] sm:$0x7] }
 0x23f   :  { %v2046_v23 = vpop.eup %2045  ;;  %2057 = vtanh.f32 %v702_v21  ;;  %v813_v24 = vpack.c.bf16 %v791_v20, %v789_v19  ;;  %v896_v19 = vsub.s32 2, %v2409_v45  ;;  %v2462_v20 = vrot.slane %v884_v18, %v475_v46 }
 0x240   :  { %v2048_v25 = vpop.eup %2047  ;;  %v760_v26 = vadd.f32 1.0, %v2046_v23  ;;  %2059 = vtanh.f32 %v703_v22  ;;  %v667_v27 = vpop.f32.mrb[28].mxu1  ;;  %v2466_v21 = vrot.slane %v884_v18, %v479_v49 }
 0x241   :  { %v2050_v28 = vpop.eup %2049  ;;  %v761_v29 = vadd.f32 1.0, %v2048_v25  ;;  %v668_v30 = vadd.f32 %v667_v27, %v2418_v50  ;;  %v669_v31 = vpop.f32.mrb[29].mxu1  ;;  %1229 = vmatprep.mubr.bf16.mxu0 %v813_v24  ;;  %1334 = vmatprep.mubr.bf16.mxu1 %v813_v24  ;;  %v2468_v23 = vrot.slane %v884_v18, %v896_v19 }
 0x242   :  { %v2052_v32 = vpop.eup %2051  ;;  %v762_v33 = vadd.f32 1.0, %v2050_v28  ;;  %v670_v34 = vadd.f32 %v669_v31, %v2422_v51  ;;  %v671_v48 = vpop.f32.mrb[30].mxu1  ;;  %1230 = vmatmul.mubr.bf16.gmra.mrb[48].mxu0 %v812_v7  ;;  %1335 = vmatmul.mubr.bf16.gmra.mrb[48].mxu1 %v812_v7  ;;  %v792_v39 = vmul.f32 0.5, %v760_v26 }
 0x243   :  { %v763_v35 = vadd.f32 1.0, %v2052_v32  ;;  %v704_v36 = vmul.f32 0.5, %v668_v30  ;;  %v672_v37 = vadd.f32 %v671_v48, %v2418_v50  ;;  %v673_v38 = vpop.f32.mrb[31].mxu1  ;;  %v793_v43 = vmul.f32 0.5, %v761_v29 }
 0x244   :  { %v794_v40 = vmul.f32 0.5, %v762_v33  ;;  %v705_v41 = vmul.f32 0.5, %v670_v34  ;;  %v674_v42 = vadd.f32 %v673_v38, %v2422_v51 }
 0x245   :  { %v795_v44 = vmul.f32 0.5, %v763_v35  ;;  %2061 = vtanh.f32 %v704_v36  ;;  %v706_v47 = vmul.f32 0.5, %v672_v37 }
 0x246   :  { %2063 = vtanh.f32 %v705_v41  ;;  %v707_v52 = vmul.f32 0.5, %v674_v42  ;;  %v814_v53 = vpack.c.bf16 %v794_v40, %v792_v39 }
 0x247   :  { %v2054_v54 = vpop.eup %2053  ;;  %2065 = vtanh.f32 %v706_v47  ;;  %v815_v55 = vpack.c.bf16 %v795_v44, %v793_v43 }
 0x248   :  { %v2056_v56 = vpop.eup %2055  ;;  %v764_v57 = vadd.f32 1.0, %v2054_v54  ;;  %2067 = vtanh.f32 %v707_v52 }
 0x249   :  { %v2058_v50 = vpop.eup %2057  ;;  %v765_v58 = vadd.f32 1.0, %v2056_v56  ;;  %1239 = vmatprep.mubr.bf16.mxu0 %v815_v55  ;;  %1342 = vmatprep.mubr.bf16.mxu1 %v815_v55 }
 0x24a   :  { %v2060_v59 = vpop.eup %2059  ;;  %v766_v60 = vadd.f32 1.0, %v2058_v50  ;;  %1240 = vmatmul.mubr.bf16.gmra.mrb[52].mxu0 %v814_v53  ;;  %1343 = vmatmul.mubr.bf16.gmra.mrb[52].mxu1 %v814_v53  ;;  %v796_v61 = vmul.f32 0.5, %v764_v57 }
 0x24b   :  { %v767_v51 = vadd.f32 1.0, %v2060_v59  ;;  %v797_v63 = vmul.f32 0.5, %v765_v58 }
 0x24c   :  { %v798_v62 = vmul.f32 0.5, %v766_v60 }
 0x24d   :  { %v799_v0 = vmul.f32 0.5, %v767_v51 }
 0x24e   :  { %v816_v1 = vpack.c.bf16 %v798_v62, %v796_v61 }
 0x24f   :  { %v2062_v2 = vpop.eup %2061  ;;  %v817_v3 = vpack.c.bf16 %v799_v0, %v797_v63 }
 0x250   :  { %v2064_v4 = vpop.eup %2063  ;;  %v768_v5 = vadd.f32 1.0, %v2062_v2 }
 0x251   :  { %v2066_v6 = vpop.eup %2065  ;;  %v769_v8 = vadd.f32 1.0, %v2064_v4  ;;  %1249 = vmatprep.mubr.bf16.mxu0 %v817_v3  ;;  %1350 = vmatprep.mubr.bf16.mxu1 %v817_v3 }
 0x252   :  { %v2068_v9 = vpop.eup %2067  ;;  %v770_v10 = vadd.f32 1.0, %v2066_v6  ;;  %1250 = vmatmul.mubr.bf16.gmra.mrb[56].mxu0 %v816_v1  ;;  %1351 = vmatmul.mubr.bf16.gmra.mrb[56].mxu1 %v816_v1  ;;  %v800_v12 = vmul.f32 0.5, %v768_v5 }
 0x253   :  { %v771_v11 = vadd.f32 1.0, %v2068_v9  ;;  %v801_v14 = vmul.f32 0.5, %v769_v8 }
 0x254   :  { %v802_v13 = vmul.f32 0.5, %v770_v10 }
 0x255   :  { %v803_v15 = vmul.f32 0.5, %v771_v11 }
 0x256   :  { %v818_v16 = vpack.c.bf16 %v802_v13, %v800_v12 }
 0x257   :  { %v819_v17 = vpack.c.bf16 %v803_v15, %v801_v14 }
 0x259   :  { %1259 = vmatprep.mubr.bf16.mxu0 %v819_v17  ;;  %1358 = vmatprep.mubr.bf16.mxu1 %v819_v17 }
 0x25a   :  { %1260 = vmatmul.mubr.bf16.gmra.mrb[60].mxu0 %v818_v16  ;;  %1359 = vmatmul.mubr.bf16.gmra.mrb[60].mxu1 %v818_v16 }
 0x2f5   :  { %v1191_v22 = vpop.f32.mrb[32].mxu0  ;;  %v1790_v7 = vpop.f32.mrb[32].mxu1 }
 0x2f6   :  { %v1192_v24 = vadd.f32 %v1191_v22, %v2462_v20  ;;  %v1193_v25 = vpop.f32.mrb[33].mxu0  ;;  %v1791_v26 = vpop.f32.mrb[33].mxu1 }
 0x2f7   :  { %v1194_v27 = vadd.f32 %v1193_v25, %v2466_v21  ;;  %v1792_v28 = vadd.f32 %v1791_v26, %v1790_v7  ;;  %v1195_v29 = vpop.f32.mrb[34].mxu0  ;;  %v1793_v30 = vpop.f32.mrb[34].mxu1 }
 0x2f8   :  { %v1367_v31 = vmul.f32 0.5, %v1192_v24  ;;  %v1196_v46 = vadd.f32 %v1195_v29, %v2462_v20  ;;  %v1197_v32 = vpop.f32.mrb[35].mxu0  ;;  %v1794_v45 = vpop.f32.mrb[35].mxu1 }
 0x2f9   :  { %v1368_v49 = vmul.f32 0.5, %v1194_v27  ;;  %v1305_v33 = vadd.f32 %v1792_v28, %v2468_v23  ;;  %v1198_v34 = vadd.f32 %v1197_v32, %v2466_v21  ;;  %v1795_v48 = vadd.f32 %v1794_v45, %v1793_v30 }
 0x2fa   :  { %2069 = vtanh.f32 %v1367_v31  ;;  %v1370_v35 = vmul.f32 0.5, %v1196_v46 }
 0x2fb   :  { %2071 = vtanh.f32 %v1368_v49  ;;  %v1369_v36 = vmul.f32 0.5, %v1305_v33  ;;  %v1371_v37 = vmul.f32 0.5, %v1198_v34  ;;  %v1308_v38 = vadd.f32 %v1795_v48, %v2468_v23 }
 0x2fc   :  { %2073 = vtanh.f32 %v1370_v35 }
 0x2fd   :  { %2075 = vtanh.f32 %v1369_v36  ;;  %v1372_v39 = vmul.f32 0.5, %v1308_v38  ;;  %v1201_v40 = vpop.f32.mrb[36].mxu0  ;;  %v1796_v41 = vpop.f32.mrb[36].mxu1 }
 0x2fe   :  { %2077 = vtanh.f32 %v1371_v37  ;;  %v1202_v42 = vadd.f32 %v1201_v40, %v2462_v20  ;;  %v1203_v43 = vpop.f32.mrb[37].mxu0  ;;  %v1797_v44 = vpop.f32.mrb[37].mxu1 }
 0x2ff   :  { %2079 = vtanh.f32 %v1372_v39  ;;  %v1204_v47 = vadd.f32 %v1203_v43, %v2466_v21  ;;  %v1798_v52 = vadd.f32 %v1797_v44, %v1796_v41  ;;  %v1205_v53 = vpop.f32.mrb[38].mxu0  ;;  %v1799_v54 = vpop.f32.mrb[38].mxu1 }
 0x300   :  { %v1373_v55 = vmul.f32 0.5, %v1202_v42  ;;  %v1206_v56 = vadd.f32 %v1205_v53, %v2462_v20  ;;  %v1207_v57 = vpop.f32.mrb[39].mxu0  ;;  %v1800_v50 = vpop.f32.mrb[39].mxu1 }
 0x301   :  { %v1374_v58 = vmul.f32 0.5, %v1204_v47  ;;  %v1313_v59 = vadd.f32 %v1798_v52, %v2468_v23  ;;  %v1208_v60 = vadd.f32 %v1207_v57, %v2466_v21  ;;  %v1801_v51 = vadd.f32 %v1800_v50, %v1799_v54 }
 0x302   :  { %2081 = vtanh.f32 %v1373_v55  ;;  %v1376_v61 = vmul.f32 0.5, %v1206_v56 }
 0x303   :  { %2083 = vtanh.f32 %v1374_v58  ;;  %v1375_v62 = vmul.f32 0.5, %v1313_v59  ;;  %v1377_v63 = vmul.f32 0.5, %v1208_v60  ;;  %v1316_v0 = vadd.f32 %v1801_v51, %v2468_v23 }
 0x304   :  { %v2070_v1 = vpop.eup %2069  ;;  %2085 = vtanh.f32 %v1376_v61 }
 0x305   :  { %v2072_v2 = vpop.eup %2071  ;;  %v1463_v3 = vadd.f32 1.0, %v2070_v1  ;;  %2087 = vtanh.f32 %v1375_v62  ;;  %v1378_v4 = vmul.f32 0.5, %v1316_v0  ;;  %v1211_v5 = vpop.f32.mrb[40].mxu0 }
 0x306   :  { %v1802_v6 = vpop.f32.mrb[40].mxu1  ;;  %v2074_v8 = vpop.eup %2073  ;;  %v1464_v9 = vadd.f32 1.0, %v2072_v2  ;;  %2089 = vtanh.f32 %v1377_v63  ;;  %v1212_v10 = vadd.f32 %v1211_v5, %v2462_v20 }
 0x307   :  { %v1213_v11 = vpop.f32.mrb[41].mxu0  ;;  %v1803_v12 = vpop.f32.mrb[41].mxu1  ;;  %v1511_v14 = vmul.f32 0.5, %v1463_v3  ;;  %v1466_v15 = vadd.f32 1.0, %v2074_v8  ;;  %2091 = vtanh.f32 %v1378_v4 }
 0x308   :  { %v2076_v13 = vpop.eup %2075  ;;  %v1214_v16 = vadd.f32 %v1213_v11, %v2466_v21  ;;  %v1215_v17 = vpop.f32.mrb[42].mxu0  ;;  %v1512_v22 = vmul.f32 0.5, %v1464_v9  ;;  %v1379_v24 = vmul.f32 0.5, %v1212_v10  ;;  %v1804_v25 = vadd.f32 %v1803_v12, %v1802_v6 }
 0x309   :  { %v1805_v18 = vpop.f32.mrb[42].mxu1  ;;  %v2078_v19 = vpop.eup %2077  ;;  %v1465_v7 = vadd.f32 1.0, %v2076_v13  ;;  %1559 = vst [vmem:[%s2669_s7] sm:$0xff] %v1511_v14  ;;  %v1514_v29 = vmul.f32 0.5, %v1466_v15  ;;  %v1216_v46 = vadd.f32 %v1215_v17, %v2462_v20 }
 0x30a   :  { %v1217_v26 = vpop.f32.mrb[43].mxu0  ;;  %v1806_v27 = vpop.f32.mrb[43].mxu1  ;;  %v1467_v30 = vadd.f32 1.0, %v2078_v19  ;;  %v1380_v31 = vmul.f32 0.5, %v1214_v16  ;;  %1560 = vst [vmem:[%s2669_s7 + $0x8] sm:$0xff] %v1512_v22  ;;  %2093 = vtanh.f32 %v1379_v24  ;;  %v1321_v49 = vadd.f32 %v1804_v25, %v2468_v23 }
 0x30b   :  { %v2080_v28 = vpop.eup %2079  ;;  %v1513_v32 = vmul.f32 0.5, %v1465_v7  ;;  %1562 = vst [vmem:[%s2669_s7 + $0x18] sm:$0xff] %v1514_v29  ;;  %v1382_v34 = vmul.f32 0.5, %v1216_v46  ;;  %v1218_v48 = vadd.f32 %v1217_v26, %v2466_v21  ;;  %v1807_v38 = vadd.f32 %v1806_v27, %v1805_v18 }
 0x30c   :  { %v1468_v45 = vadd.f32 1.0, %v2080_v28  ;;  %v1515_v33 = vmul.f32 0.5, %v1467_v30  ;;  %2095 = vtanh.f32 %v1380_v31  ;;  %v2082_v35 = vpop.eup %2081  ;;  %v1381_v37 = vmul.f32 0.5, %v1321_v49 }
 0x30d   :  { %1561 = vst [vmem:[%s2669_s7 + $0x10] sm:$0xff] %v1513_v32  ;;  %v2084_v39 = vpop.eup %2083  ;;  %v1469_v40 = vadd.f32 1.0, %v2082_v35  ;;  %2097 = vtanh.f32 %v1382_v34  ;;  %v1383_v41 = vmul.f32 0.5, %v1218_v48  ;;  %v1221_v42 = vpop.f32.mrb[44].mxu0  ;;  %v1324_v52 = vadd.f32 %v1807_v38, %v2468_v23 }
 0x30e   :  { %v1516_v36 = vmul.f32 0.5, %v1468_v45  ;;  %1563 = vst [vmem:[%s2669_s7 + $0x20] sm:$0xff] %v1515_v33  ;;  %v1808_v43 = vpop.f32.mrb[44].mxu1  ;;  %v2086_v44 = vpop.eup %2085  ;;  %v1470_v47 = vadd.f32 1.0, %v2084_v39  ;;  %2099 = vtanh.f32 %v1381_v37  ;;  %v1222_v53 = vadd.f32 %v1221_v42, %v2462_v20 }
 0x30f   :  { %v1223_v54 = vpop.f32.mrb[45].mxu0  ;;  %v1809_v55 = vpop.f32.mrb[45].mxu1  ;;  %v1517_v57 = vmul.f32 0.5, %v1469_v40  ;;  %v1472_v50 = vadd.f32 1.0, %v2086_v44  ;;  %2101 = vtanh.f32 %v1383_v41  ;;  %v1384_v63 = vmul.f32 0.5, %v1324_v52 }
 0x310   :  { %1564 = vst [vmem:[%s2669_s7 + $0x28] sm:$0xff] %v1516_v36  ;;  %v2088_v56 = vpop.eup %2087  ;;  %v1224_v58 = vadd.f32 %v1223_v54, %v2466_v21  ;;  %v1225_v59 = vpop.f32.mrb[46].mxu0  ;;  %v1518_v61 = vmul.f32 0.5, %v1470_v47  ;;  %v1385_v0 = vmul.f32 0.5, %v1222_v53  ;;  %v1810_v8 = vadd.f32 %v1809_v55, %v1808_v43 }
 0x311   :  { %v1811_v60 = vpop.f32.mrb[46].mxu1  ;;  %v2090_v51 = vpop.eup %2089  ;;  %v1471_v62 = vadd.f32 1.0, %v2088_v56  ;;  %1565 = vst [vmem:[%s2669_s7 + $0x30] sm:$0xff] %v1517_v57  ;;  %v1520_v4 = vmul.f32 0.5, %v1472_v50  ;;  %2103 = vtanh.f32 %v1384_v63  ;;  %v1226_v11 = vadd.f32 %v1225_v59, %v2462_v20 }
 0x312   :  { %v1227_v1 = vpop.f32.mrb[47].mxu0  ;;  %v1812_v2 = vpop.f32.mrb[47].mxu1  ;;  %v1473_v5 = vadd.f32 1.0, %v2090_v51  ;;  %v1386_v6 = vmul.f32 0.5, %v1224_v58  ;;  %1566 = vst [vmem:[%s2669_s7 + $0x38] sm:$0xff] %v1518_v61  ;;  %2105 = vtanh.f32 %v1385_v0  ;;  %v1329_v13 = vadd.f32 %v1810_v8, %v2468_v23 }
 0x313   :  { %v2092_v3 = vpop.eup %2091  ;;  %v1519_v9 = vmul.f32 0.5, %v1471_v62  ;;  %1568 = vst [vmem:[%s2669_s7 + $0x48] sm:$0xff] %v1520_v4  ;;  %v1228_v14 = vadd.f32 %v1227_v1, %v2466_v21  ;;  %v1388_v17 = vmul.f32 0.5, %v1226_v11  ;;  %v1813_v18 = vadd.f32 %v1812_v2, %v1811_v60 }
 0x314   :  { %v1474_v10 = vadd.f32 1.0, %v2092_v3  ;;  %v1521_v12 = vmul.f32 0.5, %v1473_v5  ;;  %v2094_v15 = vpop.eup %2093  ;;  %2107 = vtanh.f32 %v1386_v6  ;;  %v1387_v7 = vmul.f32 0.5, %v1329_v13 }
 0x315   :  { %1567 = vst [vmem:[%s2669_s7 + $0x40] sm:$0xff] %v1519_v9  ;;  %v1475_v22 = vadd.f32 1.0, %v2094_v15  ;;  %v1389_v24 = vmul.f32 0.5, %v1228_v14  ;;  %v1231_v25 = vpop.f32.mrb[48].mxu0  ;;  %v1814_v26 = vpop.f32.mrb[48].mxu1  ;;  %2109 = vtanh.f32 %v1388_v17  ;;  %v1332_v28 = vadd.f32 %v1813_v18, %v2468_v23 }
 0x316   :  { %v1522_v16 = vmul.f32 0.5, %v1474_v10  ;;  %v2096_v19 = vpop.eup %2095  ;;  %1569 = vst [vmem:[%s2669_s7 + $0x50] sm:$0xff] %v1521_v12  ;;  %v1232_v29 = vadd.f32 %v1231_v25, %v2462_v20  ;;  %v1233_v30 = vpop.f32.mrb[49].mxu0  ;;  %2111 = vtanh.f32 %v1387_v7 }
 0x317   :  { %v1476_v27 = vadd.f32 1.0, %v2096_v19  ;;  %v1815_v31 = vpop.f32.mrb[49].mxu1  ;;  %v2098_v46 = vpop.eup %2097  ;;  %v1523_v32 = vmul.f32 0.5, %v1475_v22  ;;  %v1234_v45 = vadd.f32 %v1233_v30, %v2466_v21  ;;  %2113 = vtanh.f32 %v1389_v24 }
 0x318   :  { %1570 = vst [vmem:[%s2669_s7 + $0x58] sm:$0xff] %v1522_v16  ;;  %v1816_v49 = vadd.f32 %v1815_v31, %v1814_v26  ;;  %v1235_v33 = vpop.f32.mrb[50].mxu0  ;;  %v1817_v34 = vpop.f32.mrb[50].mxu1  ;;  %v1478_v36 = vadd.f32 1.0, %v2098_v46  ;;  %v1390_v37 = vmul.f32 0.5, %v1332_v28  ;;  %v1391_v42 = vmul.f32 0.5, %v1232_v29 }
 0x319   :  { %v2100_v48 = vpop.eup %2099  ;;  %v1524_v35 = vmul.f32 0.5, %v1476_v27  ;;  %v1237_v38 = vpop.f32.mrb[51].mxu0  ;;  %1571 = vst [vmem:[%s2669_s7 + $0x60] sm:$0xff] %v1523_v32  ;;  %v1392_v43 = vmul.f32 0.5, %v1234_v45  ;;  %v1236_v53 = vadd.f32 %v1235_v33, %v2462_v20 }
 0x31a   :  { %v1818_v39 = vpop.f32.mrb[51].mxu1  ;;  %v2102_v40 = vpop.eup %2101  ;;  %v1477_v41 = vadd.f32 1.0, %v2100_v48  ;;  %v1337_v44 = vadd.f32 %v1816_v49, %v2468_v23  ;;  %v1526_v47 = vmul.f32 0.5, %v1478_v36  ;;  %2115 = vtanh.f32 %v1390_v37 }
 0x31b   :  { %1572 = vst [vmem:[%s2669_s7 + $0x68] sm:$0xff] %v1524_v35  ;;  %v1479_v52 = vadd.f32 1.0, %v2102_v40  ;;  %2117 = vtanh.f32 %v1391_v42  ;;  %v1238_v56 = vadd.f32 %v1237_v38, %v2466_v21  ;;  %v2104_v57 = vpop.eup %2103  ;;  %v1394_v58 = vmul.f32 0.5, %v1236_v53 }
 0x31c   :  { %v1525_v54 = vmul.f32 0.5, %v1477_v41  ;;  %v1393_v55 = vmul.f32 0.5, %v1337_v44  ;;  %1574 = vst [vmem:[%s2669_s7 + $0x78] sm:$0xff] %v1526_v47  ;;  %2119 = vtanh.f32 %v1392_v43  ;;  %v1819_v59 = vadd.f32 %v1818_v39, %v1817_v34  ;;  %v2106_v60 = vpop.eup %2105 }
 0x31d   :  { %v1527_v50 = vmul.f32 0.5, %v1479_v52  ;;  %v1480_v51 = vadd.f32 1.0, %v2104_v57  ;;  %v1395_v61 = vmul.f32 0.5, %v1238_v56  ;;  %v1241_v62 = vpop.f32.mrb[52].mxu0  ;;  %v1820_v63 = vpop.f32.mrb[52].mxu1  ;;  %v1481_v1 = vadd.f32 1.0, %v2106_v60 }
 0x31e   :  { %1573 = vst [vmem:[%s2669_s7 + $0x70] sm:$0xff] %v1525_v54  ;;  %2121 = vtanh.f32 %v1393_v55  ;;  %v2108_v0 = vpop.eup %2107  ;;  %v1340_v2 = vadd.f32 %v1819_v59, %v2468_v23  ;;  %v1242_v3 = vadd.f32 %v1241_v62, %v2462_v20  ;;  %v1243_v4 = vpop.f32.mrb[53].mxu0 }
 0x31f   :  { %1575 = vst [vmem:[%s2669_s7 + $0x80] sm:$0xff] %v1527_v50  ;;  %2123 = vtanh.f32 %v1394_v58  ;;  %v1821_v5 = vpop.f32.mrb[53].mxu1  ;;  %v1528_v6 = vmul.f32 0.5, %v1480_v51  ;;  %v1482_v8 = vadd.f32 1.0, %v2108_v0  ;;  %v1244_v9 = vadd.f32 %v1243_v4, %v2466_v21  ;;  %v1245_v10 = vpop.f32.mrb[54].mxu0 }
 0x320   :  { %2125 = vtanh.f32 %v1395_v61  ;;  %v1823_v11 = vpop.f32.mrb[54].mxu1  ;;  %v2110_v12 = vpop.eup %2109  ;;  %v1529_v13 = vmul.f32 0.5, %v1481_v1  ;;  %v1396_v14 = vmul.f32 0.5, %v1340_v2  ;;  %v1397_v15 = vmul.f32 0.5, %v1242_v3 }
 0x321   :  { %v1822_v16 = vadd.f32 %v1821_v5, %v1820_v63  ;;  %v1247_v17 = vpop.f32.mrb[55].mxu0  ;;  %v1824_v18 = vpop.f32.mrb[55].mxu1  ;;  %1576 = vst [vmem:[%s2669_s7 + $0x88] sm:$0xff] %v1528_v6  ;;  %v1530_v22 = vmul.f32 0.5, %v1482_v8  ;;  %v1484_v7 = vadd.f32 1.0, %v2110_v12  ;;  %v1398_v24 = vmul.f32 0.5, %v1244_v9 }
 0x322   :  { %v2112_v19 = vpop.eup %2111  ;;  %v1246_v25 = vadd.f32 %v1245_v10, %v2462_v20  ;;  %1577 = vst [vmem:[%s2669_s7 + $0x90] sm:$0xff] %v1529_v13  ;;  %2127 = vtanh.f32 %v1396_v14  ;;  %v1248_v29 = vadd.f32 %v1247_v17, %v2466_v21  ;;  %v1825_v36 = vadd.f32 %v1824_v18, %v1823_v11 }
 0x323   :  { %v2114_v26 = vpop.eup %2113  ;;  %v1483_v27 = vadd.f32 1.0, %v2112_v19  ;;  %v1345_v28 = vadd.f32 %v1822_v16, %v2468_v23  ;;  %1578 = vst [vmem:[%s2669_s7 + $0x98] sm:$0xff] %v1530_v22  ;;  %v1532_v30 = vmul.f32 0.5, %v1484_v7  ;;  %2129 = vtanh.f32 %v1397_v15 }
 0x324   :  { %v1485_v31 = vadd.f32 1.0, %v2114_v26  ;;  %v1400_v46 = vmul.f32 0.5, %v1246_v25  ;;  %v2116_v32 = vpop.eup %2115  ;;  %2131 = vtanh.f32 %v1398_v24  ;;  %v1401_v33 = vmul.f32 0.5, %v1248_v29 }
 0x325   :  { %v1531_v45 = vmul.f32 0.5, %v1483_v27  ;;  %v1399_v49 = vmul.f32 0.5, %v1345_v28  ;;  %v2118_v34 = vpop.eup %2117  ;;  %1580 = vst [vmem:[%s2669_s7 + $0xa8] sm:$0xff] %v1532_v30  ;;  %v1486_v35 = vadd.f32 1.0, %v2116_v32  ;;  %v1251_v37 = vpop.f32.mrb[56].mxu0  ;;  %v1348_v53 = vadd.f32 %v1825_v36, %v2468_v23 }
 0x326   :  { %v1533_v48 = vmul.f32 0.5, %v1485_v31  ;;  %2133 = vtanh.f32 %v1400_v46  ;;  %v1826_v38 = vpop.f32.mrb[56].mxu1  ;;  %v2120_v39 = vpop.eup %2119  ;;  %v1487_v40 = vadd.f32 1.0, %v2118_v34  ;;  %v1252_v41 = vadd.f32 %v1251_v37, %v2462_v20 }
 0x327   :  { %1579 = vst [vmem:[%s2669_s7 + $0xa0] sm:$0xff] %v1531_v45  ;;  %2135 = vtanh.f32 %v1399_v49  ;;  %v1253_v42 = vpop.f32.mrb[57].mxu0  ;;  %v1827_v43 = vpop.f32.mrb[57].mxu1  ;;  %v1534_v47 = vmul.f32 0.5, %v1486_v35  ;;  %v1488_v52 = vadd.f32 1.0, %v2120_v39  ;;  %v1402_v0 = vmul.f32 0.5, %v1348_v53 }
 0x328   :  { %v2122_v44 = vpop.eup %2121  ;;  %1581 = vst [vmem:[%s2669_s7 + $0xb0] sm:$0xff] %v1533_v48  ;;  %2137 = vtanh.f32 %v1401_v33  ;;  %v1255_v54 = vpop.f32.mrb[58].mxu0  ;;  %v1535_v57 = vmul.f32 0.5, %v1487_v40  ;;  %v1403_v58 = vmul.f32 0.5, %v1252_v41  ;;  %v1254_v59 = vadd.f32 %v1253_v42, %v2466_v21 }
 0x329   :  { %v1829_v55 = vpop.f32.mrb[58].mxu1  ;;  %v2124_v56 = vpop.eup %2123  ;;  %v1489_v50 = vadd.f32 1.0, %v2122_v44  ;;  %1582 = vst [vmem:[%s2669_s7 + $0xb8] sm:$0xff] %v1534_v47  ;;  %v1536_v62 = vmul.f32 0.5, %v1488_v52  ;;  %v1828_v1 = vadd.f32 %v1827_v43, %v1826_v38  ;;  %v1256_v8 = vadd.f32 %v1255_v54, %v2462_v20 }
 0x32a   :  { %v1257_v60 = vpop.f32.mrb[59].mxu0  ;;  %v1830_v51 = vpop.f32.mrb[59].mxu1  ;;  %v1490_v63 = vadd.f32 1.0, %v2124_v56  ;;  %1583 = vst [vmem:[%s2669_s7 + $0xc0] sm:$0xff] %v1535_v57  ;;  %2139 = vtanh.f32 %v1403_v58  ;;  %v1404_v4 = vmul.f32 0.5, %v1254_v59 }
 0x32b   :  { %v2126_v61 = vpop.eup %2125  ;;  %v1537_v2 = vmul.f32 0.5, %v1489_v50  ;;  %1584 = vst [vmem:[%s2669_s7 + $0xc8] sm:$0xff] %v1536_v62  ;;  %2141 = vtanh.f32 %v1402_v0  ;;  %v1353_v6 = vadd.f32 %v1828_v1, %v2468_v23  ;;  %v1258_v11 = vadd.f32 %v1257_v60, %v2466_v21 }
 0x32c   :  { %v1491_v3 = vadd.f32 1.0, %v2126_v61  ;;  %v1538_v5 = vmul.f32 0.5, %v1490_v63  ;;  %v2128_v9 = vpop.eup %2127  ;;  %2143 = vtanh.f32 %v1404_v4  ;;  %v1831_v12 = vadd.f32 %v1830_v51, %v1829_v55 }
 0x32d   :  { %1585 = vst [vmem:[%s2669_s7 + $0xd0] sm:$0xff] %v1537_v2  ;;  %v2130_v13 = vpop.eup %2129  ;;  %v1492_v14 = vadd.f32 1.0, %v2128_v9  ;;  %v1405_v15 = vmul.f32 0.5, %v1353_v6  ;;  %v1406_v16 = vmul.f32 0.5, %v1256_v8  ;;  %v1261_v17 = vpop.f32.mrb[60].mxu0  ;;  %v1407_v7 = vmul.f32 0.5, %v1258_v11 }
 0x32e   :  { %v1539_v10 = vmul.f32 0.5, %v1491_v3  ;;  %1586 = vst [vmem:[%s2669_s7 + $0xd8] sm:$0xff] %v1538_v5  ;;  %v1832_v18 = vpop.f32.mrb[60].mxu1  ;;  %v2132_v19 = vpop.eup %2131  ;;  %v1493_v22 = vadd.f32 1.0, %v2130_v13  ;;  %v1356_v24 = vadd.f32 %v1831_v12, %v2468_v23  ;;  %v1262_v25 = vadd.f32 %v1261_v17, %v2462_v20 }
 0x32f   :  { %v1263_v26 = vpop.f32.mrb[61].mxu0  ;;  %v1833_v27 = vpop.f32.mrb[61].mxu1  ;;  %v1540_v29 = vmul.f32 0.5, %v1492_v14  ;;  %v1494_v30 = vadd.f32 1.0, %v2132_v19  ;;  %2145 = vtanh.f32 %v1405_v15 }
 0x330   :  { %1587 = vst [vmem:[%s2669_s7 + $0xe0] sm:$0xff] %v1539_v10  ;;  %v2134_v28 = vpop.eup %2133  ;;  %v1264_v31 = vadd.f32 %v1263_v26, %v2466_v21  ;;  %v1265_v46 = vpop.f32.mrb[62].mxu0  ;;  %v1541_v49 = vmul.f32 0.5, %v1493_v22  ;;  %2147 = vtanh.f32 %v1406_v16  ;;  %v1408_v34 = vmul.f32 0.5, %v1356_v24 }
 0x331   :  { %v1835_v32 = vpop.f32.mrb[62].mxu1  ;;  %v2136_v45 = vpop.eup %2135  ;;  %v1496_v33 = vadd.f32 1.0, %v2134_v28  ;;  %1588 = vst [vmem:[%s2669_s7 + $0xe8] sm:$0xff] %v1540_v29  ;;  %v1542_v37 = vmul.f32 0.5, %v1494_v30  ;;  %2149 = vtanh.f32 %v1407_v7  ;;  %v1409_v39 = vmul.f32 0.5, %v1262_v25 }
 0x332   :  { %v1267_v48 = vpop.f32.mrb[63].mxu0  ;;  %v1836_v35 = vpop.f32.mrb[63].mxu1  ;;  %v1495_v38 = vadd.f32 1.0, %v2136_v45  ;;  %1589 = vst [vmem:[%s2669_s7 + $0xf0] sm:$0xff] %v1541_v49  ;;  %2151 = vtanh.f32 %v1408_v34  ;;  %v1410_v42 = vmul.f32 0.5, %v1264_v31  ;;  %v1834_v44 = vadd.f32 %v1833_v27, %v1832_v18 }
 0x333   :  { %v2138_v36 = vpop.eup %2137  ;;  %v1544_v40 = vmul.f32 0.5, %v1496_v33  ;;  %1590 = vst [vmem:[%s2669_s7 + $0xf8] sm:$0xff] %v1542_v37  ;;  %2153 = vtanh.f32 %v1409_v39  ;;  %v1266_v47 = vadd.f32 %v1265_v46, %v2462_v20  ;;  %v1268_v54 = vadd.f32 %v1267_v48, %v2466_v21 }
 0x334   :  { %v1497_v41 = vadd.f32 1.0, %v2138_v36  ;;  %v1543_v43 = vmul.f32 0.5, %v1495_v38  ;;  %v2140_v52 = vpop.eup %2139  ;;  %2155 = vtanh.f32 %v1410_v42  ;;  %v1837_v55 = vadd.f32 %v1836_v35, %v1835_v32 }
 0x335   :  { %1592 = vst [vmem:[%s2669_s7 + $0x108] sm:$0xff] %v1544_v40  ;;  %v2142_v56 = vpop.eup %2141  ;;  %v1499_v57 = vadd.f32 1.0, %v2140_v52  ;;  %v1361_v50 = vadd.f32 %v1834_v44, %v2468_v23  ;;  %v1412_v58 = vmul.f32 0.5, %v1266_v47  ;;  %v1413_v60 = vmul.f32 0.5, %v1268_v54 }
 0x336   :  { %v1545_v53 = vmul.f32 0.5, %v1497_v41  ;;  %1591 = vst [vmem:[%s2669_s7 + $0x100] sm:$0xff] %v1543_v43  ;;  %v2144_v20 = vpop.eup %2143  ;;  %v1498_v59 = vadd.f32 1.0, %v2142_v56  ;;  %v1364_v51 = vadd.f32 %v1837_v55, %v2468_v23 }
 0x337   :  { %v1547_v21 = vmul.f32 0.5, %v1499_v57  ;;  %v1500_v61 = vadd.f32 1.0, %v2144_v20  ;;  %v1411_v62 = vmul.f32 0.5, %v1361_v50  ;;  %2157 = vtanh.f32 %v1412_v58 }
 0x338   :  { %1593 = vst [vmem:[%s2669_s7 + $0x110] sm:$0xff] %v1545_v53  ;;  %v1546_v63 = vmul.f32 0.5, %v1498_v59  ;;  %2159 = vtanh.f32 %v1413_v60  ;;  %v1414_v0 = vmul.f32 0.5, %v1364_v51 }
 0x339   :  { %v2146_v1 = vpop.eup %2145  ;;  %1595 = vst [vmem:[%s2669_s7 + $0x120] sm:$0xff] %v1547_v21  ;;  %v1548_v2 = vmul.f32 0.5, %v1500_v61  ;;  %2161 = vtanh.f32 %v1411_v62 }
 0x33a   :  { %v2148_v3 = vpop.eup %2147  ;;  %1594 = vst [vmem:[%s2669_s7 + $0x118] sm:$0xff] %v1546_v63  ;;  %v1501_v23 = vadd.f32 1.0, %v2146_v1  ;;  %2163 = vtanh.f32 %v1414_v0 }
 0x33b   :  { %v2150_v4 = vpop.eup %2149  ;;  %1596 = vst [vmem:[%s2669_s7 + $0x128] sm:$0xff] %v1548_v2  ;;  %v1502_v5 = vadd.f32 1.0, %v2148_v3 }
 0x33c   :  { %v2152_v6 = vpop.eup %2151  ;;  %v1549_v8 = vmul.f32 0.5, %v1501_v23  ;;  %v1503_v9 = vadd.f32 1.0, %v2150_v4 }
 0x33d   :  { %v2154_v10 = vpop.eup %2153  ;;  %v1550_v11 = vmul.f32 0.5, %v1502_v5  ;;  %v1504_v12 = vadd.f32 1.0, %v2152_v6 }
 0x33e   :  { %v2156_v13 = vpop.eup %2155  ;;  %1597 = vst [vmem:[%s2669_s7 + $0x130] sm:$0xff] %v1549_v8  ;;  %v1551_v14 = vmul.f32 0.5, %v1503_v9  ;;  %v1505_v15 = vadd.f32 1.0, %v2154_v10 }
 0x33f   :  { %1598 = vst [vmem:[%s2669_s7 + $0x138] sm:$0xff] %v1550_v11  ;;  %v1552_v16 = vmul.f32 0.5, %v1504_v12  ;;  %v1506_v17 = vadd.f32 1.0, %v2156_v13 }
 0x340   :  { %1599 = vst [vmem:[%s2669_s7 + $0x140] sm:$0xff] %v1551_v14  ;;  %v1553_v18 = vmul.f32 0.5, %v1505_v15 }
 0x341   :  { %v2158_v19 = vpop.eup %2157  ;;  %1600 = vst [vmem:[%s2669_s7 + $0x148] sm:$0xff] %v1552_v16  ;;  %v1554_v22 = vmul.f32 0.5, %v1506_v17 }
 0x342   :  { %v2160_v7 = vpop.eup %2159  ;;  %1601 = vst [vmem:[%s2669_s7 + $0x150] sm:$0xff] %v1553_v18  ;;  %v1508_v24 = vadd.f32 1.0, %v2158_v19 }
 0x343   :  { %v2162_v25 = vpop.eup %2161  ;;  %1602 = vst [vmem:[%s2669_s7 + $0x158] sm:$0xff] %v1554_v22  ;;  %v1509_v26 = vadd.f32 1.0, %v2160_v7 }
 0x344   :  { %v2164_v27 = vpop.eup %2163  ;;  %v1507_v28 = vadd.f32 1.0, %v2162_v25  ;;  %v1556_v29 = vmul.f32 0.5, %v1508_v24 }
 0x345   :  { %v1557_v30 = vmul.f32 0.5, %v1509_v26  ;;  %v1510_v31 = vadd.f32 1.0, %v2164_v27 }
 0x346   :  { %v1555_v46 = vmul.f32 0.5, %v1507_v28  ;;  %1604 = vst [vmem:[%s2669_s7 + $0x168] sm:$0xff] %v1556_v29 }
 0x347   :  { %1605 = vst [vmem:[%s2669_s7 + $0x170] sm:$0xff] %v1557_v30  ;;  %v1558_v32 = vmul.f32 0.5, %v1510_v31 }
 0x348   :  { %1603 = vst [vmem:[%s2669_s7 + $0x160] sm:$0xff] %v1555_v46 }
 0x349   :  { %1606 = vst [vmem:[%s2669_s7 + $0x178] sm:$0xff] %v1558_v32 }
 0x34a   :  { %1611 = vsyncpa [#allocation3], 1 }
 0x34b   :  { %1612 = vsyncpa [#allocation5], 1 }

</bundles_post_ra>
